<compile_context>
chip_gen: v5e
topology: v5e:2x2
jax: 0.10.0
libtpu: 0.0.40
codegen_flags: <defaults>
</compile_context>

<pallas_src>
import math
import functools

import jax
import jax.numpy as jnp
from jax.experimental import pallas as pl
from jax.experimental.pallas import tpu as pltpu

_VMEM_LIMIT = 32 * 1024 * 1024        # explicit scoped-VMEM cap (safe on v5e/v6e/v7x)
_GELU_C = 0.7978845608028654


# ---------------------------------------------------------------------------
# tile-size helpers (fall back to the full dim when it cannot be tiled legally)
# ---------------------------------------------------------------------------
def _row_tile(dim, preferred=256):
    if dim <= preferred:
        return dim
    for t in (preferred, 256, 128, 64, 32, 16, 8):
        if t <= preferred and dim % t == 0:
            return t
    return dim


def _lane_tile(dim, preferred=512):
    # last-dim block sizes must be multiples of 128 or equal to the full dim
    if dim <= preferred:
        return dim
    for t in (preferred, 512, 384, 256, 128):
        if t <= preferred and t % 128 == 0 and dim % t == 0:
            return t
    return dim


def _head_block(n, preferred=8):
    for hb in range(min(n, preferred), 0, -1):
        if n % hb == 0:
            return hb
    return 1


# ---------------------------------------------------------------------------
# kernel 1/4: LayerNorm + (x @ W + b) [+ tanh-GELU]
# ---------------------------------------------------------------------------
def _ln_matmul_kernel(x_ref, g_ref, b_ref, w_ref, bias_ref, o_ref, *, eps, use_gelu):
    x = x_ref[...]                                         # [tm, H] f32
    mu = jnp.mean(x, axis=-1, keepdims=True)
    var = jnp.mean((x - mu) ** 2, axis=-1, keepdims=True)
    ln = (x - mu) * jax.lax.rsqrt(var + eps) * g_ref[...] + b_ref[...]
    y = jnp.dot(ln.astype(jnp.bfloat16), w_ref[...],
                preferred_element_type=jnp.float32) + bias_ref[...]
    if use_gelu:
        y = 0.5 * y * (1.0 + jnp.tanh(_GELU_C * y * (1.0 + 0.044715 * y * y)))
    o_ref[...] = y.astype(o_ref.dtype)


def _ln_matmul(x, g, b, w, bias, *, eps, use_gelu, out_dtype):
    M, H = x.shape
    N = w.shape[1]
    tm = _row_tile(M)
    tn = _lane_tile(N)
    grid = (M // tm, N // tn)
    flops = 2 * M * H * N + 8 * M * H * (N // tn)
    trans = M * N if use_gelu else M * (N // tn)
    bytes_accessed = 4 * M * H * (N // tn) + 2 * H * N + out_dtype(0).itemsize * M * N
    return pl.pallas_call(
        functools.partial(_ln_matmul_kernel, eps=eps, use_gelu=use_gelu),
        out_shape=jax.ShapeDtypeStruct((M, N), out_dtype),
        grid=grid,
        in_specs=[
            pl.BlockSpec((tm, H), lambda i, j: (i, 0)),     # x rows (full H for LN)
            pl.BlockSpec((1, H), lambda i, j: (0, 0)),      # ln gamma
            pl.BlockSpec((1, H), lambda i, j: (0, 0)),      # ln beta
            pl.BlockSpec((H, tn), lambda i, j: (0, j)),     # weight, N-tiled
            pl.BlockSpec((1, tn), lambda i, j: (0, j)),     # bias, N-tiled
        ],
        out_specs=pl.BlockSpec((tm, tn), lambda i, j: (i, j)),
        compiler_params=pltpu.CompilerParams(
            dimension_semantics=("parallel", "parallel"),
            vmem_limit_bytes=_VMEM_LIMIT),
        cost_estimate=pl.CostEstimate(flops=int(flops), transcendentals=int(trans),
                                      bytes_accessed=int(bytes_accessed)),
    )(x, g, b, w, bias)


# ---------------------------------------------------------------------------
# kernel 2: flash attention, batched over a block of heads
# ---------------------------------------------------------------------------
def _flash_attn_kernel(q_ref, k_ref, v_ref, mask_ref, o_ref,
                       m_sc, l_sc, acc_sc, *, scale):
    ki = pl.program_id(3)

    @pl.when(ki == 0)
    def _():
        m_sc[...] = jnp.full_like(m_sc, -jnp.inf)
        l_sc[...] = jnp.zeros_like(l_sc)
        acc_sc[...] = jnp.zeros_like(acc_sc)

    q = q_ref[0]                                           # [hb, tq, hn] bf16
    k = k_ref[0]                                           # [hb, tk, hn] bf16
    v = v_ref[0]                                           # [hb, tk, hn] bf16

    # Fold the 1/sqrt(hn) scale into the mask once per (tq, tk) tile so the
    # big [hb, tq, tk] score tensor gets a single multiply + add.
    mask = mask_ref[...]                                   # [tq, tk] f32
    mask_scaled = mask * scale                             # scale * mask
    neg_bias = mask * 10000.0 - 10000.0                    # -10000 * (1 - mask)

    s = jnp.einsum('hqd,hkd->hqk', q, k,
                   preferred_element_type=jnp.float32)
    s = s * mask_scaled + neg_bias                         # broadcast over head dim

    m_prev = m_sc[...]
    m_new = jnp.maximum(m_prev, jnp.max(s, axis=-1, keepdims=True))
    alpha = jnp.exp(m_prev - m_new)
    p = jnp.exp(s - m_new)
    l_sc[...] = alpha * l_sc[...] + jnp.sum(p, axis=-1, keepdims=True)
    acc_sc[...] = alpha * acc_sc[...] + jnp.einsum(
        'hqk,hkd->hqd', p.astype(v.dtype), v, preferred_element_type=jnp.float32)
    m_sc[...] = m_new

    @pl.when(ki == pl.num_programs(3) - 1)
    def _():
        o_ref[0] = (acc_sc[...] *
                    pl.reciprocal(l_sc[...], approx=True)).astype(o_ref.dtype)


def _flash_attention(q, k, v, mask, *, scale):
    B, n, S, hn = q.shape
    hb = _head_block(n)
    tq = _row_tile(S)
    tk = _lane_tile(S, preferred=256)
    grid = (B, n // hb, S // tq, S // tk)
    flops = 4 * B * n * S * S * hn
    trans = B * n * S * S
    bytes_accessed = 3 * B * n * S * hn * 2 + B * n * S * hn * 2 + S * S * 4
    return pl.pallas_call(
        functools.partial(_flash_attn_kernel, scale=scale),
        out_shape=jax.ShapeDtypeStruct((B, n, S, hn), q.dtype),
        grid=grid,
        in_specs=[
            pl.BlockSpec((1, hb, tq, hn), lambda b, h, qi, ki: (b, h, qi, 0)),
            pl.BlockSpec((1, hb, tk, hn), lambda b, h, qi, ki: (b, h, ki, 0)),
            pl.BlockSpec((1, hb, tk, hn), lambda b, h, qi, ki: (b, h, ki, 0)),
            pl.BlockSpec((tq, tk), lambda b, h, qi, ki: (qi, ki)),
        ],
        out_specs=pl.BlockSpec((1, hb, tq, hn), lambda b, h, qi, ki: (b, h, qi, 0)),
        scratch_shapes=[
            pltpu.VMEM((hb, tq, 1), jnp.float32),          # running max
            pltpu.VMEM((hb, tq, 1), jnp.float32),          # running sum
            pltpu.VMEM((hb, tq, hn), jnp.float32),         # accumulator
        ],
        compiler_params=pltpu.CompilerParams(
            dimension_semantics=("parallel", "parallel", "parallel", "arbitrary"),
            vmem_limit_bytes=_VMEM_LIMIT),
        cost_estimate=pl.CostEstimate(flops=int(flops), transcendentals=int(trans),
                                      bytes_accessed=int(bytes_accessed)),
    )(q, k, v, mask)


# ---------------------------------------------------------------------------
# kernel 3/5: (a @ W + b) + residual, K-tiled with a f32 VMEM accumulator
# ---------------------------------------------------------------------------
def _matmul_bias_residual_kernel(a_ref, w_ref, bias_ref, res_ref, o_ref, acc_ref):
    kk = pl.program_id(2)

    @pl.when(kk == 0)
    def _():
        acc_ref[...] = jnp.zeros_like(acc_ref)

    acc_ref[...] += jnp.dot(a_ref[...], w_ref[...],
                            preferred_element_type=jnp.float32)

    @pl.when(kk == pl.num_programs(2) - 1)
    def _():
        o_ref[...] = (acc_ref[...] + bias_ref[...] + res_ref[...]).astype(o_ref.dtype)


def _matmul_bias_residual(a, w, bias, res, *, out_dtype=jnp.float32):
    M, K = a.shape
    N = w.shape[1]
    tm = _row_tile(M)
    tn = _lane_tile(N)
    tkk = _lane_tile(K, preferred=512)      # K-tile keeps the weight slab small
    grid = (M // tm, N // tn, K // tkk)
    bytes_accessed = (M * K * 2 * (N // tn) + K * N * 2 + M * N * 4
                      + M * N * out_dtype(0).itemsize)
    return pl.pallas_call(
        _matmul_bias_residual_kernel,
        out_shape=jax.ShapeDtypeStruct((M, N), out_dtype),
        grid=grid,
        in_specs=[
            pl.BlockSpec((tm, tkk), lambda i, j, k: (i, k)),   # activation rows
            pl.BlockSpec((tkk, tn), lambda i, j, k: (k, j)),   # weight, K/N-tiled
            pl.BlockSpec((1, tn), lambda i, j, k: (0, j)),     # bias
            pl.BlockSpec((tm, tn), lambda i, j, k: (i, j)),    # residual
        ],
        out_specs=pl.BlockSpec((tm, tn), lambda i, j, k: (i, j)),
        scratch_shapes=[pltpu.VMEM((tm, tn), jnp.float32)],
        compiler_params=pltpu.CompilerParams(
            dimension_semantics=("parallel", "parallel", "arbitrary"),
            vmem_limit_bytes=_VMEM_LIMIT),
        cost_estimate=pl.CostEstimate(flops=int(2 * M * K * N), transcendentals=0,
                                      bytes_accessed=int(bytes_accessed)),
    )(a, w, bias, res)


# ---------------------------------------------------------------------------
# full layer
# ---------------------------------------------------------------------------
def gpt2_transformer_layer(x, ltor_mask, params, *, num_heads, eps=1e-5):
    """x: [B, S, H] float32; ltor_mask: [S, S] float32 (1 = keep, 0 = mask)."""
    B, S, H = x.shape
    hn = H // num_heads
    M = B * S
    bf16 = jnp.bfloat16

    x2 = x.reshape(M, H)
    mask = ltor_mask.astype(jnp.float32)

    # weights participate in matmuls only -> bf16 (ideally stored as bf16)
    w_qkv = params['w_qkv'].astype(bf16)
    w_attn = params['w_attn'].astype(bf16)
    w_fc = params['w_fc'].astype(bf16)
    w_proj = params['w_proj'].astype(bf16)

    # 1) LN1 + fused QKV projection
    qkv = _ln_matmul(x2, params['ln1_g'], params['ln1_b'], w_qkv,
                     params['b_qkv'], eps=eps, use_gelu=False, out_dtype=bf16)
    q, k, v = jnp.split(qkv, 3, axis=-1)

    def to_heads(t):                                        # [M, H] -> [B, n, S, hn]
        return t.reshape(B, S, num_heads, hn).transpose(0, 2, 1, 3)

    # 2) flash attention (batched over heads, online softmax)
    ctx = _flash_attention(to_heads(q), to_heads(k), to_heads(v), mask,
                           scale=1.0 / math.sqrt(hn))
    ctx2 = ctx.transpose(0, 2, 1, 3).reshape(M, H)          # [M, H] bf16, lane dense

    # 3) attention output projection + residual (f32 residual path)
    ln_input = _matmul_bias_residual(ctx2, w_attn, params['b_attn'], x2)

    # 4) LN2 + h->4h + tanh-GELU
    h4g = _ln_matmul(ln_input, params['ln2_g'], params['ln2_b'], w_fc,
                     params['b_fc'], eps=eps, use_gelu=True, out_dtype=bf16)

    # 5) 4h->h projection + residual
    out2 = _matmul_bias_residual(h4g, w_proj, params['b_proj'], ln_input)
    return out2.reshape(B, S, H)


# ---------------------------------------------------------------------------
# params + pure-JAX reference
# ---------------------------------------------------------------------------
def init_params(key, hidden_size):
    h = hidden_size
    ks = jax.random.split(key, 4)
    std = 0.02
    return {
        'ln1_g': jnp.ones((1, h), jnp.float32),
        'ln1_b': jnp.zeros((1, h), jnp.float32),
        'w_qkv': jax.random.normal(ks[0], (h, 3 * h), jnp.float32) * std,
        'b_qkv': jnp.zeros((1, 3 * h), jnp.float32),
        'w_attn': jax.random.normal(ks[1], (h, h), jnp.float32) * std,
        'b_attn': jnp.zeros((1, h), jnp.float32),
        'ln2_g': jnp.ones((1, h), jnp.float32),
        'ln2_b': jnp.zeros((1, h), jnp.float32),
        'w_fc': jax.random.normal(ks[2], (h, 4 * h), jnp.float32) * std,
        'b_fc': jnp.zeros((1, 4 * h), jnp.float32),
        'w_proj': jax.random.normal(ks[3], (4 * h, h), jnp.float32) * std,
        'b_proj': jnp.zeros((1, h), jnp.float32),
    }


def _reference(x, mask, p, *, num_heads, eps=1e-5):
    B, S, H = x.shape
    hn = H // num_heads

    def ln(v, g, b):
        mu = jnp.mean(v, -1, keepdims=True)
        var = jnp.mean((v - mu) ** 2, -1, keepdims=True)
        return (v - mu) / jnp.sqrt(var + eps) * g[0] + b[0]

    def gelu(v):
        return 0.5 * v * (1.0 + jnp.tanh(_GELU_C * v * (1.0 + 0.044715 * v * v)))

    l1 = ln(x, p['ln1_g'], p['ln1_b'])
    qkv = l1 @ p['w_qkv'] + p['b_qkv'][0]
    q, k, v = jnp.split(qkv, 3, axis=-1)

    def heads(t):
        return t.reshape(B, S, num_heads, hn).transpose(0, 2, 1, 3)

    qh, kh, vh = heads(q), heads(k), heads(v)
    scores = jnp.einsum('bnqd,bnkd->bnqk', qh, kh) / math.sqrt(hn)
    scores = scores * mask - 10000.0 * (1.0 - mask)
    probs = jax.nn.softmax(scores, axis=-1)
    ctx = jnp.einsum('bnqk,bnkd->bnqd', probs, vh)
    ctx = ctx.transpose(0, 2, 1, 3).reshape(B, S, H)
    attn = ctx @ p['w_attn'] + p['b_attn'][0]
    ln_in = x + attn
    l2 = ln(ln_in, p['ln2_g'], p['ln2_b'])
    mlp = gelu(l2 @ p['w_fc'] + p['b_fc'][0]) @ p['w_proj'] + p['b_proj'][0]
    return ln_in + mlp


if __name__ == "__main__":
    B, S, H, N_HEADS = 2, 8, 32, 4
    EPS = 1e-5

    key = jax.random.PRNGKey(0)
    kx, kp = jax.random.split(key)
    x = jax.random.normal(kx, (B, S, H), jnp.float32)
    ltor_mask = jnp.tril(jnp.ones((S, S), jnp.float32))     # causal mask
    params = init_params(kp, H)

    layer = jax.jit(lambda xx, mm, pp: gpt2_transformer_layer(
        xx, mm, pp, num_heads=N_HEADS, eps=EPS))
    out = jax.block_until_ready(layer(x, ltor_mask, params))

    ref = _reference(x, ltor_mask, params, num_heads=N_HEADS, eps=EPS)
    assert out.shape == (B, S, H)
    # tolerance loosened for bf16 matmul operands + approx reciprocal
    assert jnp.allclose(out, ref, atol=2e-2, rtol=2e-2), "mismatch vs reference"

    print("KERNEL_OK")
</pallas_src>

<mosaic_0001>
module attributes {stable_mosaic.version = 11 : i64} {
  func.func @_ln_matmul_kernel(%arg0: i32, %arg1: i32, %arg2: memref<16x32xf32, #tpu.memory_space<vmem>>, %arg3: memref<1x32xf32, #tpu.memory_space<vmem>>, %arg4: memref<1x32xf32, #tpu.memory_space<vmem>>, %arg5: memref<32x96xbf16, #tpu.memory_space<vmem>>, %arg6: memref<1x96xf32, #tpu.memory_space<vmem>>, %arg7: memref<16x96xbf16, #tpu.memory_space<vmem>>) attributes {dimension_semantics = [#tpu.dimension_semantics<parallel>, #tpu.dimension_semantics<parallel>], iteration_bounds = array<i64: 1, 1>, scalar_prefetch = 0 : i64, scratch_operands = 0 : i64, tpu.core_type = #tpu.core_type<tc>, window_params = [{transform_indices = @transform_0, window_bounds = array<i64: 16, 32>}, {pipeline_mode = #tpu.pipeline_mode<synchronous>, transform_indices = @transform_1, window_bounds = array<i64: 1, 32>}, {pipeline_mode = #tpu.pipeline_mode<synchronous>, transform_indices = @transform_2, window_bounds = array<i64: 1, 32>}, {transform_indices = @transform_3, window_bounds = array<i64: 32, 96>}, {transform_indices = @transform_4, window_bounds = array<i64: 1, 96>}, {transform_indices = @transform_5, window_bounds = array<i64: 16, 96>}]} {
    %c0 = arith.constant 0 : index
    %c0_0 = arith.constant 0 : index
    %0 = vector.load %arg2[%c0, %c0_0] : memref<16x32xf32, #tpu.memory_space<vmem>>, vector<16x32xf32>
    %cst = arith.constant dense<0.000000e+00> : vector<16xf32>
    %1 = vector.multi_reduction <add>, %0, %cst [1] : vector<16x32xf32> to vector<16xf32>
    %2 = vector.shape_cast %1 : vector<16xf32> to vector<16x1xf32>
    %cst_1 = arith.constant 3.200000e+01 : f32
    %3 = vector.broadcast %cst_1 : f32 to vector<16x1xf32>
    %4 = arith.divf %2, %3 : vector<16x1xf32>
    %5 = vector.broadcast %4 : vector<16x1xf32> to vector<16x32xf32>
    %6 = arith.subf %0, %5 : vector<16x32xf32>
    %7 = arith.mulf %6, %6 : vector<16x32xf32>
    %cst_2 = arith.constant dense<0.000000e+00> : vector<16xf32>
    %8 = vector.multi_reduction <add>, %7, %cst_2 [1] : vector<16x32xf32> to vector<16xf32>
    %9 = vector.shape_cast %8 : vector<16xf32> to vector<16x1xf32>
    %cst_3 = arith.constant 3.200000e+01 : f32
    %10 = vector.broadcast %cst_3 : f32 to vector<16x1xf32>
    %11 = arith.divf %9, %10 : vector<16x1xf32>
    %12 = vector.broadcast %4 : vector<16x1xf32> to vector<16x32xf32>
    %13 = arith.subf %0, %12 : vector<16x32xf32>
    %cst_4 = arith.constant 9.99999974E-6 : f32
    %14 = vector.broadcast %cst_4 : f32 to vector<16x1xf32>
    %15 = arith.addf %11, %14 : vector<16x1xf32>
    %16 = math.rsqrt %15 : vector<16x1xf32>
    %17 = vector.broadcast %16 : vector<16x1xf32> to vector<16x32xf32>
    %18 = arith.mulf %13, %17 : vector<16x32xf32>
    %c0_5 = arith.constant 0 : index
    %c0_6 = arith.constant 0 : index
    %19 = vector.load %arg3[%c0_5, %c0_6] : memref<1x32xf32, #tpu.memory_space<vmem>>, vector<1x32xf32>
    %20 = vector.broadcast %19 : vector<1x32xf32> to vector<16x32xf32>
    %21 = arith.mulf %18, %20 : vector<16x32xf32>
    %c0_7 = arith.constant 0 : index
    %c0_8 = arith.constant 0 : index
    %22 = vector.load %arg4[%c0_7, %c0_8] : memref<1x32xf32, #tpu.memory_space<vmem>>, vector<1x32xf32>
    %23 = vector.broadcast %22 : vector<1x32xf32> to vector<16x32xf32>
    %24 = arith.addf %21, %23 : vector<16x32xf32>
    %25 = arith.truncf %24 : vector<16x32xf32> to vector<16x32xbf16>
    %c0_9 = arith.constant 0 : index
    %c0_10 = arith.constant 0 : index
    %26 = vector.load %arg5[%c0_9, %c0_10] : memref<32x96xbf16, #tpu.memory_space<vmem>>, vector<32x96xbf16>
    %cst_11 = arith.constant dense<0.000000e+00> : vector<16x96xf32>
    %27 = tpu.matmul %25, %26, %cst_11 {dimension_numbers = #tpu.dot_dimension_numbers<[1], [0], [0], [1], [0, 0, 1, 1], [], []>} : vector<16x32xbf16>, vector<32x96xbf16>, vector<16x96xf32> -> vector<16x96xf32>
    %c0_12 = arith.constant 0 : index
    %c0_13 = arith.constant 0 : index
    %28 = vector.load %arg6[%c0_12, %c0_13] : memref<1x96xf32, #tpu.memory_space<vmem>>, vector<1x96xf32>
    %29 = vector.broadcast %28 : vector<1x96xf32> to vector<16x96xf32>
    %30 = arith.addf %27, %29 : vector<16x96xf32>
    %31 = arith.truncf %30 : vector<16x96xf32> to vector<16x96xbf16>
    %c0_14 = arith.constant 0 : index
    %c0_15 = arith.constant 0 : index
    %32 = vector.load %arg7[%c0_14, %c0_15] : memref<16x96xbf16, #tpu.memory_space<vmem>>, vector<16x96xbf16>
    tpu.vector_store %arg7[%c0_14, %c0_15], %31 {strides = array<i32>} : memref<16x96xbf16, #tpu.memory_space<vmem>>, vector<16x96xbf16>,
    return
  }
  func.func @transform_0(%arg0: i32, %arg1: i32) -> (i32, i32) {
    %c0_i32 = arith.constant 0 : i32
    %c0_i32_0 = arith.constant 0 : i32
    return %arg0, %c0_i32 : i32, i32
  }
  func.func @transform_1(%arg0: i32, %arg1: i32) -> (i32, i32) {
    %c0_i32 = arith.constant 0 : i32
    %c0_i32_0 = arith.constant 0 : i32
    %c0_i32_1 = arith.constant 0 : i32
    return %c0_i32, %c0_i32_0 : i32, i32
  }
  func.func @transform_2(%arg0: i32, %arg1: i32) -> (i32, i32) {
    %c0_i32 = arith.constant 0 : i32
    %c0_i32_0 = arith.constant 0 : i32
    %c0_i32_1 = arith.constant 0 : i32
    return %c0_i32, %c0_i32_0 : i32, i32
  }
  func.func @transform_3(%arg0: i32, %arg1: i32) -> (i32, i32) {
    %c0_i32 = arith.constant 0 : i32
    %c0_i32_0 = arith.constant 0 : i32
    return %c0_i32, %arg1 : i32, i32
  }
  func.func @transform_4(%arg0: i32, %arg1: i32) -> (i32, i32) {
    %c0_i32 = arith.constant 0 : i32
    %c0_i32_0 = arith.constant 0 : i32
    return %c0_i32, %arg1 : i32, i32
  }
  func.func @transform_5(%arg0: i32, %arg1: i32) -> (i32, i32) {
    %c0_i32 = arith.constant 0 : i32
    return %arg0, %arg1 : i32, i32
  }
}

module attributes {stable_mosaic.version = 11 : i64} {
  func.func @_flash_attn_kernel(%arg0: i32, %arg1: i32, %arg2: i32, %arg3: i32, %arg4: memref<1x4x8x8xbf16, #tpu.memory_space<vmem>>, %arg5: memref<1x4x8x8xbf16, #tpu.memory_space<vmem>>, %arg6: memref<1x4x8x8xbf16, #tpu.memory_space<vmem>>, %arg7: memref<8x8xf32, #tpu.memory_space<vmem>>, %arg8: memref<1x4x8x8xbf16, #tpu.memory_space<vmem>>, %arg9: memref<4x8x1xf32, #tpu.memory_space<vmem>>, %arg10: memref<4x8x1xf32, #tpu.memory_space<vmem>>, %arg11: memref<4x8x8xf32, #tpu.memory_space<vmem>>) attributes {dimension_semantics = [#tpu.dimension_semantics<parallel>, #tpu.dimension_semantics<parallel>, #tpu.dimension_semantics<parallel>, #tpu.dimension_semantics<arbitrary>], iteration_bounds = array<i64: 2, 1, 1, 1>, scalar_prefetch = 0 : i64, scratch_operands = 3 : i64, tpu.core_type = #tpu.core_type<tc>, window_params = [{transform_indices = @transform_0, window_bounds = array<i64: 1, 4, 8, 8>}, {transform_indices = @transform_1, window_bounds = array<i64: 1, 4, 8, 8>}, {transform_indices = @transform_2, window_bounds = array<i64: 1, 4, 8, 8>}, {transform_indices = @transform_3, window_bounds = array<i64: 8, 8>}, {transform_indices = @transform_4, window_bounds = array<i64: 1, 4, 8, 8>}]} {
    %c0_i32 = arith.constant 0 : i32
    %0 = arith.cmpi eq, %arg3, %c0_i32 : i32
    %1 = arith.extui %0 : i1 to i32
    %c0_i32_0 = arith.constant 0 : i32
    %2 = arith.cmpi ne, %1, %c0_i32_0 : i32
    scf.if %2 {
      %cst_40 = arith.constant 0xFF800000 : f32
      %49 = vector.broadcast %cst_40 : f32 to vector<4x8x1xf32>
      %c0_41 = arith.constant 0 : index
      %c0_42 = arith.constant 0 : index
      %c0_43 = arith.constant 0 : index
      %50 = vector.load %arg9[%c0_41, %c0_42, %c0_43] : memref<4x8x1xf32, #tpu.memory_space<vmem>>, vector<4x8x1xf32>
      tpu.vector_store %arg9[%c0_41, %c0_42, %c0_43], %49 {strides = array<i32>} : memref<4x8x1xf32, #tpu.memory_space<vmem>>, vector<4x8x1xf32>,
      %cst_44 = arith.constant 0.000000e+00 : f32
      %51 = vector.broadcast %cst_44 : f32 to vector<4x8x1xf32>
      %c0_45 = arith.constant 0 : index
      %c0_46 = arith.constant 0 : index
      %c0_47 = arith.constant 0 : index
      %52 = vector.load %arg10[%c0_45, %c0_46, %c0_47] : memref<4x8x1xf32, #tpu.memory_space<vmem>>, vector<4x8x1xf32>
      tpu.vector_store %arg10[%c0_45, %c0_46, %c0_47], %51 {strides = array<i32>} : memref<4x8x1xf32, #tpu.memory_space<vmem>>, vector<4x8x1xf32>,
      %cst_48 = arith.constant 0.000000e+00 : f32
      %53 = vector.broadcast %cst_48 : f32 to vector<4x8x8xf32>
      %c0_49 = arith.constant 0 : index
      %c0_50 = arith.constant 0 : index
      %c0_51 = arith.constant 0 : index
      %54 = vector.load %arg11[%c0_49, %c0_50, %c0_51] : memref<4x8x8xf32, #tpu.memory_space<vmem>>, vector<4x8x8xf32>
      tpu.vector_store %arg11[%c0_49, %c0_50, %c0_51], %53 {strides = array<i32>} : memref<4x8x8xf32, #tpu.memory_space<vmem>>, vector<4x8x8xf32>,
    } else {
    }
    %c0 = arith.constant 0 : index
    %c0_1 = arith.constant 0 : index
    %c0_2 = arith.constant 0 : index
    %c0_3 = arith.constant 0 : index
    %3 = vector.load %arg4[%c0, %c0_1, %c0_2, %c0_3] : memref<1x4x8x8xbf16, #tpu.memory_space<vmem>>, vector<1x4x8x8xbf16>
    %4 = vector.shape_cast %3 : vector<1x4x8x8xbf16> to vector<4x8x8xbf16>
    %c0_4 = arith.constant 0 : index
    %c0_5 = arith.constant 0 : index
    %c0_6 = arith.constant 0 : index
    %c0_7 = arith.constant 0 : index
    %5 = vector.load %arg5[%c0_4, %c0_5, %c0_6, %c0_7] : memref<1x4x8x8xbf16, #tpu.memory_space<vmem>>, vector<1x4x8x8xbf16>
    %6 = vector.shape_cast %5 : vector<1x4x8x8xbf16> to vector<4x8x8xbf16>
    %c0_8 = arith.constant 0 : index
    %c0_9 = arith.constant 0 : index
    %c0_10 = arith.constant 0 : index
    %c0_11 = arith.constant 0 : index
    %7 = vector.load %arg6[%c0_8, %c0_9, %c0_10, %c0_11] : memref<1x4x8x8xbf16, #tpu.memory_space<vmem>>, vector<1x4x8x8xbf16>
    %8 = vector.shape_cast %7 : vector<1x4x8x8xbf16> to vector<4x8x8xbf16>
    %c0_12 = arith.constant 0 : index
    %c0_13 = arith.constant 0 : index
    %9 = vector.load %arg7[%c0_12, %c0_13] : memref<8x8xf32, #tpu.memory_space<vmem>>, vector<8x8xf32>
    %cst = arith.constant 0.353553385 : f32
    %10 = vector.broadcast %cst : f32 to vector<8x8xf32>
    %11 = arith.mulf %9, %10 : vector<8x8xf32>
    %cst_14 = arith.constant 1.000000e+04 : f32
    %12 = vector.broadcast %cst_14 : f32 to vector<8x8xf32>
    %13 = arith.mulf %9, %12 : vector<8x8xf32>
    %cst_15 = arith.constant 1.000000e+04 : f32
    %14 = vector.broadcast %cst_15 : f32 to vector<8x8xf32>
    %15 = arith.subf %13, %14 : vector<8x8xf32>
    "tpu.trace_start"() <{level = 10 : i32, message = "hqd,hkd->hqk"}> : () -> ()
    %cst_16 = arith.constant dense<0.000000e+00> : vector<4x8x8xf32>
    %16 = tpu.matmul %4, %6, %cst_16 {dimension_numbers = #tpu.dot_dimension_numbers<[2], [2], [1], [1], [0, 0, 0, 1, 1, 1], [0], [0]>} : vector<4x8x8xbf16>, vector<4x8x8xbf16>, vector<4x8x8xf32> -> vector<4x8x8xf32>
    "tpu.trace_stop"() : () -> ()
    %17 = vector.shape_cast %11 : vector<8x8xf32> to vector<1x8x8xf32>
    %18 = vector.broadcast %17 : vector<1x8x8xf32> to vector<4x8x8xf32>
    %19 = arith.mulf %16, %18 : vector<4x8x8xf32>
    %20 = vector.shape_cast %15 : vector<8x8xf32> to vector<1x8x8xf32>
    %21 = vector.broadcast %20 : vector<1x8x8xf32> to vector<4x8x8xf32>
    %22 = arith.addf %19, %21 : vector<4x8x8xf32>
    %c0_17 = arith.constant 0 : index
    %c0_18 = arith.constant 0 : index
    %c0_19 = arith.constant 0 : index
    %23 = vector.load %arg9[%c0_17, %c0_18, %c0_19] : memref<4x8x1xf32, #tpu.memory_space<vmem>>, vector<4x8x1xf32>
    %cst_20 = arith.constant dense<0xFF800000> : vector<4x8xf32>
    %24 = vector.multi_reduction <maximumf>, %22, %cst_20 [2] : vector<4x8x8xf32> to vector<4x8xf32>
    %25 = vector.shape_cast %24 : vector<4x8xf32> to vector<4x8x1xf32>
    %26 = arith.maximumf %23, %25 : vector<4x8x1xf32>
    %27 = arith.subf %23, %26 : vector<4x8x1xf32>
    %28 = math.exp %27 : vector<4x8x1xf32>
    %29 = vector.broadcast %26 : vector<4x8x1xf32> to vector<4x8x8xf32>
    %30 = arith.subf %22, %29 : vector<4x8x8xf32>
    %31 = math.exp %30 : vector<4x8x8xf32>
    %c0_21 = arith.constant 0 : index
    %c0_22 = arith.constant 0 : index
    %c0_23 = arith.constant 0 : index
    %32 = vector.load %arg10[%c0_21, %c0_22, %c0_23] : memref<4x8x1xf32, #tpu.memory_space<vmem>>, vector<4x8x1xf32>
    %33 = arith.mulf %28, %32 : vector<4x8x1xf32>
    %cst_24 = arith.constant dense<0.000000e+00> : vector<4x8xf32>
    %34 = vector.multi_reduction <add>, %31, %cst_24 [2] : vector<4x8x8xf32> to vector<4x8xf32>
    %35 = vector.shape_cast %34 : vector<4x8xf32> to vector<4x8x1xf32>
    %36 = arith.addf %33, %35 : vector<4x8x1xf32>
    %c0_25 = arith.constant 0 : index
    %c0_26 = arith.constant 0 : index
    %c0_27 = arith.constant 0 : index
    %37 = vector.load %arg10[%c0_25, %c0_26, %c0_27] : memref<4x8x1xf32, #tpu.memory_space<vmem>>, vector<4x8x1xf32>
    tpu.vector_store %arg10[%c0_25, %c0_26, %c0_27], %36 {strides = array<i32>} : memref<4x8x1xf32, #tpu.memory_space<vmem>>, vector<4x8x1xf32>,
    %c0_28 = arith.constant 0 : index
    %c0_29 = arith.constant 0 : index
    %c0_30 = arith.constant 0 : index
    %38 = vector.load %arg11[%c0_28, %c0_29, %c0_30] : memref<4x8x8xf32, #tpu.memory_space<vmem>>, vector<4x8x8xf32>
    %39 = vector.broadcast %28 : vector<4x8x1xf32> to vector<4x8x8xf32>
    %40 = arith.mulf %39, %38 : vector<4x8x8xf32>
    %41 = arith.truncf %31 : vector<4x8x8xf32> to vector<4x8x8xbf16>
    "tpu.trace_start"() <{level = 10 : i32, message = "hqk,hkd->hqd"}> : () -> ()
    %cst_31 = arith.constant dense<0.000000e+00> : vector<4x8x8xf32>
    %42 = tpu.matmul %41, %8, %cst_31 {dimension_numbers = #tpu.dot_dimension_numbers<[2], [1], [1], [2], [0, 0, 0, 1, 1, 2], [0], [0]>} : vector<4x8x8xbf16>, vector<4x8x8xbf16>, vector<4x8x8xf32> -> vector<4x8x8xf32>
    "tpu.trace_stop"() : () -> ()
    %43 = arith.addf %40, %42 : vector<4x8x8xf32>
    %c0_32 = arith.constant 0 : index
    %c0_33 = arith.constant 0 : index
    %c0_34 = arith.constant 0 : index
    %44 = vector.load %arg11[%c0_32, %c0_33, %c0_34] : memref<4x8x8xf32, #tpu.memory_space<vmem>>, vector<4x8x8xf32>
    tpu.vector_store %arg11[%c0_32, %c0_33, %c0_34], %43 {strides = array<i32>} : memref<4x8x8xf32, #tpu.memory_space<vmem>>, vector<4x8x8xf32>,
    %c0_35 = arith.constant 0 : index
    %c0_36 = arith.constant 0 : index
    %c0_37 = arith.constant 0 : index
    %45 = vector.load %arg9[%c0_35, %c0_36, %c0_37] : memref<4x8x1xf32, #tpu.memory_space<vmem>>, vector<4x8x1xf32>
    tpu.vector_store %arg9[%c0_35, %c0_36, %c0_37], %26 {strides = array<i32>} : memref<4x8x1xf32, #tpu.memory_space<vmem>>, vector<4x8x1xf32>,
    %c0_i32_38 = arith.constant 0 : i32
    %46 = arith.cmpi eq, %arg3, %c0_i32_38 : i32
    %47 = arith.extui %46 : i1 to i32
    %c0_i32_39 = arith.constant 0 : i32
    %48 = arith.cmpi ne, %47, %c0_i32_39 : i32
    scf.if %48 {
      %c0_40 = arith.constant 0 : index
      %c0_41 = arith.constant 0 : index
      %c0_42 = arith.constant 0 : index
      %49 = vector.load %arg11[%c0_40, %c0_41, %c0_42] : memref<4x8x8xf32, #tpu.memory_space<vmem>>, vector<4x8x8xf32>
      %c0_43 = arith.constant 0 : index
      %c0_44 = arith.constant 0 : index
      %c0_45 = arith.constant 0 : index
      %50 = vector.load %arg10[%c0_43, %c0_44, %c0_45] : memref<4x8x1xf32, #tpu.memory_space<vmem>>, vector<4x8x1xf32>
      %51 = tpu.reciprocal %50 {approx = true} : vector<4x8x1xf32> -> vector<4x8x1xf32>
      %52 = vector.broadcast %51 : vector<4x8x1xf32> to vector<4x8x8xf32>
      %53 = arith.mulf %49, %52 : vector<4x8x8xf32>
      %54 = arith.truncf %53 : vector<4x8x8xf32> to vector<4x8x8xbf16>
      %c0_46 = arith.constant 0 : index
      %c0_47 = arith.constant 0 : index
      %c0_48 = arith.constant 0 : index
      %c0_49 = arith.constant 0 : index
      %55 = vector.load %arg8[%c0_46, %c0_47, %c0_48, %c0_49] : memref<1x4x8x8xbf16, #tpu.memory_space<vmem>>, vector<1x4x8x8xbf16>
      %56 = vector.shape_cast %55 : vector<1x4x8x8xbf16> to vector<4x8x8xbf16>
      %57 = vector.shape_cast %54 : vector<4x8x8xbf16> to vector<1x4x8x8xbf16>
      tpu.vector_store %arg8[%c0_46, %c0_47, %c0_48, %c0_49], %57 {strides = array<i32>} : memref<1x4x8x8xbf16, #tpu.memory_space<vmem>>, vector<1x4x8x8xbf16>,
    } else {
    }
    return
  }
  func.func @transform_0(%arg0: i32, %arg1: i32, %arg2: i32, %arg3: i32) -> (i32, i32, i32, i32) {
    %c0_i32 = arith.constant 0 : i32
    %c0_i32_0 = arith.constant 0 : i32
    return %arg0, %arg1, %arg2, %c0_i32 : i32, i32, i32, i32
  }
  func.func @transform_1(%arg0: i32, %arg1: i32, %arg2: i32, %arg3: i32) -> (i32, i32, i32, i32) {
    %c0_i32 = arith.constant 0 : i32
    %c0_i32_0 = arith.constant 0 : i32
    return %arg0, %arg1, %arg3, %c0_i32 : i32, i32, i32, i32
  }
  func.func @transform_2(%arg0: i32, %arg1: i32, %arg2: i32, %arg3: i32) -> (i32, i32, i32, i32) {
    %c0_i32 = arith.constant 0 : i32
    %c0_i32_0 = arith.constant 0 : i32
    return %arg0, %arg1, %arg3, %c0_i32 : i32, i32, i32, i32
  }
  func.func @transform_3(%arg0: i32, %arg1: i32, %arg2: i32, %arg3: i32) -> (i32, i32) {
    %c0_i32 = arith.constant 0 : i32
    return %arg2, %arg3 : i32, i32
  }
  func.func @transform_4(%arg0: i32, %arg1: i32, %arg2: i32, %arg3: i32) -> (i32, i32, i32, i32) {
    %c0_i32 = arith.constant 0 : i32
    %c0_i32_0 = arith.constant 0 : i32
    return %arg0, %arg1, %arg2, %c0_i32 : i32, i32, i32, i32
  }
}

module attributes {stable_mosaic.version = 11 : i64} {
  func.func @_matmul_bias_residual_kernel(%arg0: i32, %arg1: i32, %arg2: i32, %arg3: memref<16x32xbf16, #tpu.memory_space<vmem>>, %arg4: memref<32x32xbf16, #tpu.memory_space<vmem>>, %arg5: memref<1x32xf32, #tpu.memory_space<vmem>>, %arg6: memref<16x32xf32, #tpu.memory_space<vmem>>, %arg7: memref<16x32xf32, #tpu.memory_space<vmem>>, %arg8: memref<16x32xf32, #tpu.memory_space<vmem>>) attributes {dimension_semantics = [#tpu.dimension_semantics<parallel>, #tpu.dimension_semantics<parallel>, #tpu.dimension_semantics<arbitrary>], iteration_bounds = array<i64: 1, 1, 1>, scalar_prefetch = 0 : i64, scratch_operands = 1 : i64, tpu.core_type = #tpu.core_type<tc>, window_params = [{transform_indices = @transform_0, window_bounds = array<i64: 16, 32>}, {transform_indices = @transform_1, window_bounds = array<i64: 32, 32>}, {transform_indices = @transform_2, window_bounds = array<i64: 1, 32>}, {transform_indices = @transform_3, window_bounds = array<i64: 16, 32>}, {transform_indices = @transform_4, window_bounds = array<i64: 16, 32>}]} {
    %c0_i32 = arith.constant 0 : i32
    %0 = arith.cmpi eq, %arg2, %c0_i32 : i32
    %1 = arith.extui %0 : i1 to i32
    %c0_i32_0 = arith.constant 0 : i32
    %2 = arith.cmpi ne, %1, %c0_i32_0 : i32
    scf.if %2 {
      %cst_10 = arith.constant 0.000000e+00 : f32
      %12 = vector.broadcast %cst_10 : f32 to vector<16x32xf32>
      %c0_11 = arith.constant 0 : index
      %c0_12 = arith.constant 0 : index
      %13 = vector.load %arg8[%c0_11, %c0_12] : memref<16x32xf32, #tpu.memory_space<vmem>>, vector<16x32xf32>
      tpu.vector_store %arg8[%c0_11, %c0_12], %12 {strides = array<i32>} : memref<16x32xf32, #tpu.memory_space<vmem>>, vector<16x32xf32>,
    } else {
    }
    %c0 = arith.constant 0 : index
    %c0_1 = arith.constant 0 : index
    %3 = vector.load %arg8[%c0, %c0_1] : memref<16x32xf32, #tpu.memory_space<vmem>>, vector<16x32xf32>
    %c0_2 = arith.constant 0 : index
    %c0_3 = arith.constant 0 : index
    %4 = vector.load %arg3[%c0_2, %c0_3] : memref<16x32xbf16, #tpu.memory_space<vmem>>, vector<16x32xbf16>
    %c0_4 = arith.constant 0 : index
    %c0_5 = arith.constant 0 : index
    %5 = vector.load %arg4[%c0_4, %c0_5] : memref<32x32xbf16, #tpu.memory_space<vmem>>, vector<32x32xbf16>
    %cst = arith.constant dense<0.000000e+00> : vector<16x32xf32>
    %6 = tpu.matmul %4, %5, %cst {dimension_numbers = #tpu.dot_dimension_numbers<[1], [0], [0], [1], [0, 0, 1, 1], [], []>} : vector<16x32xbf16>, vector<32x32xbf16>, vector<16x32xf32> -> vector<16x32xf32>
    %7 = arith.addf %3, %6 : vector<16x32xf32>
    %c0_6 = arith.constant 0 : index
    %c0_7 = arith.constant 0 : index
    %8 = vector.load %arg8[%c0_6, %c0_7] : memref<16x32xf32, #tpu.memory_space<vmem>>, vector<16x32xf32>
    tpu.vector_store %arg8[%c0_6, %c0_7], %7 {strides = array<i32>} : memref<16x32xf32, #tpu.memory_space<vmem>>, vector<16x32xf32>,
    %c0_i32_8 = arith.constant 0 : i32
    %9 = arith.cmpi eq, %arg2, %c0_i32_8 : i32
    %10 = arith.extui %9 : i1 to i32
    %c0_i32_9 = arith.constant 0 : i32
    %11 = arith.cmpi ne, %10, %c0_i32_9 : i32
    scf.if %11 {
      %c0_10 = arith.constant 0 : index
      %c0_11 = arith.constant 0 : index
      %12 = vector.load %arg8[%c0_10, %c0_11] : memref<16x32xf32, #tpu.memory_space<vmem>>, vector<16x32xf32>
      %c0_12 = arith.constant 0 : index
      %c0_13 = arith.constant 0 : index
      %13 = vector.load %arg5[%c0_12, %c0_13] : memref<1x32xf32, #tpu.memory_space<vmem>>, vector<1x32xf32>
      %14 = vector.broadcast %13 : vector<1x32xf32> to vector<16x32xf32>
      %15 = arith.addf %12, %14 : vector<16x32xf32>
      %c0_14 = arith.constant 0 : index
      %c0_15 = arith.constant 0 : index
      %16 = vector.load %arg6[%c0_14, %c0_15] : memref<16x32xf32, #tpu.memory_space<vmem>>, vector<16x32xf32>
      %17 = arith.addf %15, %16 : vector<16x32xf32>
      %c0_16 = arith.constant 0 : index
      %c0_17 = arith.constant 0 : index
      %18 = vector.load %arg7[%c0_16, %c0_17] : memref<16x32xf32, #tpu.memory_space<vmem>>, vector<16x32xf32>
      tpu.vector_store %arg7[%c0_16, %c0_17], %17 {strides = array<i32>} : memref<16x32xf32, #tpu.memory_space<vmem>>, vector<16x32xf32>,
    } else {
    }
    return
  }
  func.func @transform_0(%arg0: i32, %arg1: i32, %arg2: i32) -> (i32, i32) {
    %c0_i32 = arith.constant 0 : i32
    return %arg0, %arg2 : i32, i32
  }
  func.func @transform_1(%arg0: i32, %arg1: i32, %arg2: i32) -> (i32, i32) {
    %c0_i32 = arith.constant 0 : i32
    return %arg2, %arg1 : i32, i32
  }
  func.func @transform_2(%arg0: i32, %arg1: i32, %arg2: i32) -> (i32, i32) {
    %c0_i32 = arith.constant 0 : i32
    %c0_i32_0 = arith.constant 0 : i32
    return %c0_i32, %arg1 : i32, i32
  }
  func.func @transform_3(%arg0: i32, %arg1: i32, %arg2: i32) -> (i32, i32) {
    %c0_i32 = arith.constant 0 : i32
    return %arg0, %arg1 : i32, i32
  }
  func.func @transform_4(%arg0: i32, %arg1: i32, %arg2: i32) -> (i32, i32) {
    %c0_i32 = arith.constant 0 : i32
    return %arg0, %arg1 : i32, i32
  }
}

module attributes {stable_mosaic.version = 11 : i64} {
  func.func @_ln_matmul_kernel(%arg0: i32, %arg1: i32, %arg2: memref<16x32xf32, #tpu.memory_space<vmem>>, %arg3: memref<1x32xf32, #tpu.memory_space<vmem>>, %arg4: memref<1x32xf32, #tpu.memory_space<vmem>>, %arg5: memref<32x128xbf16, #tpu.memory_space<vmem>>, %arg6: memref<1x128xf32, #tpu.memory_space<vmem>>, %arg7: memref<16x128xbf16, #tpu.memory_space<vmem>>) attributes {dimension_semantics = [#tpu.dimension_semantics<parallel>, #tpu.dimension_semantics<parallel>], iteration_bounds = array<i64: 1, 1>, scalar_prefetch = 0 : i64, scratch_operands = 0 : i64, tpu.core_type = #tpu.core_type<tc>, window_params = [{transform_indices = @transform_0, window_bounds = array<i64: 16, 32>}, {pipeline_mode = #tpu.pipeline_mode<synchronous>, transform_indices = @transform_1, window_bounds = array<i64: 1, 32>}, {pipeline_mode = #tpu.pipeline_mode<synchronous>, transform_indices = @transform_2, window_bounds = array<i64: 1, 32>}, {transform_indices = @transform_3, window_bounds = array<i64: 32, 128>}, {transform_indices = @transform_4, window_bounds = array<i64: 1, 128>}, {transform_indices = @transform_5, window_bounds = array<i64: 16, 128>}]} {
    %c0 = arith.constant 0 : index
    %c0_0 = arith.constant 0 : index
    %0 = vector.load %arg2[%c0, %c0_0] : memref<16x32xf32, #tpu.memory_space<vmem>>, vector<16x32xf32>
    %cst = arith.constant dense<0.000000e+00> : vector<16xf32>
    %1 = vector.multi_reduction <add>, %0, %cst [1] : vector<16x32xf32> to vector<16xf32>
    %2 = vector.shape_cast %1 : vector<16xf32> to vector<16x1xf32>
    %cst_1 = arith.constant 3.200000e+01 : f32
    %3 = vector.broadcast %cst_1 : f32 to vector<16x1xf32>
    %4 = arith.divf %2, %3 : vector<16x1xf32>
    %5 = vector.broadcast %4 : vector<16x1xf32> to vector<16x32xf32>
    %6 = arith.subf %0, %5 : vector<16x32xf32>
    %7 = arith.mulf %6, %6 : vector<16x32xf32>
    %cst_2 = arith.constant dense<0.000000e+00> : vector<16xf32>
    %8 = vector.multi_reduction <add>, %7, %cst_2 [1] : vector<16x32xf32> to vector<16xf32>
    %9 = vector.shape_cast %8 : vector<16xf32> to vector<16x1xf32>
    %cst_3 = arith.constant 3.200000e+01 : f32
    %10 = vector.broadcast %cst_3 : f32 to vector<16x1xf32>
    %11 = arith.divf %9, %10 : vector<16x1xf32>
    %12 = vector.broadcast %4 : vector<16x1xf32> to vector<16x32xf32>
    %13 = arith.subf %0, %12 : vector<16x32xf32>
    %cst_4 = arith.constant 9.99999974E-6 : f32
    %14 = vector.broadcast %cst_4 : f32 to vector<16x1xf32>
    %15 = arith.addf %11, %14 : vector<16x1xf32>
    %16 = math.rsqrt %15 : vector<16x1xf32>
    %17 = vector.broadcast %16 : vector<16x1xf32> to vector<16x32xf32>
    %18 = arith.mulf %13, %17 : vector<16x32xf32>
    %c0_5 = arith.constant 0 : index
    %c0_6 = arith.constant 0 : index
    %19 = vector.load %arg3[%c0_5, %c0_6] : memref<1x32xf32, #tpu.memory_space<vmem>>, vector<1x32xf32>
    %20 = vector.broadcast %19 : vector<1x32xf32> to vector<16x32xf32>
    %21 = arith.mulf %18, %20 : vector<16x32xf32>
    %c0_7 = arith.constant 0 : index
    %c0_8 = arith.constant 0 : index
    %22 = vector.load %arg4[%c0_7, %c0_8] : memref<1x32xf32, #tpu.memory_space<vmem>>, vector<1x32xf32>
    %23 = vector.broadcast %22 : vector<1x32xf32> to vector<16x32xf32>
    %24 = arith.addf %21, %23 : vector<16x32xf32>
    %25 = arith.truncf %24 : vector<16x32xf32> to vector<16x32xbf16>
    %c0_9 = arith.constant 0 : index
    %c0_10 = arith.constant 0 : index
    %26 = vector.load %arg5[%c0_9, %c0_10] : memref<32x128xbf16, #tpu.memory_space<vmem>>, vector<32x128xbf16>
    %cst_11 = arith.constant dense<0.000000e+00> : vector<16x128xf32>
    %27 = tpu.matmul %25, %26, %cst_11 {dimension_numbers = #tpu.dot_dimension_numbers<[1], [0], [0], [1], [0, 0, 1, 1], [], []>} : vector<16x32xbf16>, vector<32x128xbf16>, vector<16x128xf32> -> vector<16x128xf32>
    %c0_12 = arith.constant 0 : index
    %c0_13 = arith.constant 0 : index
    %28 = vector.load %arg6[%c0_12, %c0_13] : memref<1x128xf32, #tpu.memory_space<vmem>>, vector<1x128xf32>
    %29 = vector.broadcast %28 : vector<1x128xf32> to vector<16x128xf32>
    %30 = arith.addf %27, %29 : vector<16x128xf32>
    %cst_14 = arith.constant 5.000000e-01 : f32
    %31 = vector.broadcast %cst_14 : f32 to vector<16x128xf32>
    %32 = arith.mulf %31, %30 : vector<16x128xf32>
    %cst_15 = arith.constant 0.797884583 : f32
    %33 = vector.broadcast %cst_15 : f32 to vector<16x128xf32>
    %34 = arith.mulf %33, %30 : vector<16x128xf32>
    %cst_16 = arith.constant 4.471500e-02 : f32
    %35 = vector.broadcast %cst_16 : f32 to vector<16x128xf32>
    %36 = arith.mulf %35, %30 : vector<16x128xf32>
    %37 = arith.mulf %36, %30 : vector<16x128xf32>
    %cst_17 = arith.constant 1.000000e+00 : f32
    %38 = vector.broadcast %cst_17 : f32 to vector<16x128xf32>
    %39 = arith.addf %38, %37 : vector<16x128xf32>
    %40 = arith.mulf %34, %39 : vector<16x128xf32>
    %41 = math.tanh %40 : vector<16x128xf32>
    %cst_18 = arith.constant 1.000000e+00 : f32
    %42 = vector.broadcast %cst_18 : f32 to vector<16x128xf32>
    %43 = arith.addf %42, %41 : vector<16x128xf32>
    %44 = arith.mulf %32, %43 : vector<16x128xf32>
    %45 = arith.truncf %44 : vector<16x128xf32> to vector<16x128xbf16>
    %c0_19 = arith.constant 0 : index
    %c0_20 = arith.constant 0 : index
    %46 = vector.load %arg7[%c0_19, %c0_20] : memref<16x128xbf16, #tpu.memory_space<vmem>>, vector<16x128xbf16>
    tpu.vector_store %arg7[%c0_19, %c0_20], %45 {strides = array<i32>} : memref<16x128xbf16, #tpu.memory_space<vmem>>, vector<16x128xbf16>,
    return
  }
  func.func @transform_0(%arg0: i32, %arg1: i32) -> (i32, i32) {
    %c0_i32 = arith.constant 0 : i32
    %c0_i32_0 = arith.constant 0 : i32
    return %arg0, %c0_i32 : i32, i32
  }
  func.func @transform_1(%arg0: i32, %arg1: i32) -> (i32, i32) {
    %c0_i32 = arith.constant 0 : i32
    %c0_i32_0 = arith.constant 0 : i32
    %c0_i32_1 = arith.constant 0 : i32
    return %c0_i32, %c0_i32_0 : i32, i32
  }
  func.func @transform_2(%arg0: i32, %arg1: i32) -> (i32, i32) {
    %c0_i32 = arith.constant 0 : i32
    %c0_i32_0 = arith.constant 0 : i32
    %c0_i32_1 = arith.constant 0 : i32
    return %c0_i32, %c0_i32_0 : i32, i32
  }
  func.func @transform_3(%arg0: i32, %arg1: i32) -> (i32, i32) {
    %c0_i32 = arith.constant 0 : i32
    %c0_i32_0 = arith.constant 0 : i32
    return %c0_i32, %arg1 : i32, i32
  }
  func.func @transform_4(%arg0: i32, %arg1: i32) -> (i32, i32) {
    %c0_i32 = arith.constant 0 : i32
    %c0_i32_0 = arith.constant 0 : i32
    return %c0_i32, %arg1 : i32, i32
  }
  func.func @transform_5(%arg0: i32, %arg1: i32) -> (i32, i32) {
    %c0_i32 = arith.constant 0 : i32
    return %arg0, %arg1 : i32, i32
  }
}

module attributes {stable_mosaic.version = 11 : i64} {
  func.func @_matmul_bias_residual_kernel(%arg0: i32, %arg1: i32, %arg2: i32, %arg3: memref<16x128xbf16, #tpu.memory_space<vmem>>, %arg4: memref<128x32xbf16, #tpu.memory_space<vmem>>, %arg5: memref<1x32xf32, #tpu.memory_space<vmem>>, %arg6: memref<16x32xf32, #tpu.memory_space<vmem>>, %arg7: memref<16x32xf32, #tpu.memory_space<vmem>>, %arg8: memref<16x32xf32, #tpu.memory_space<vmem>>) attributes {dimension_semantics = [#tpu.dimension_semantics<parallel>, #tpu.dimension_semantics<parallel>, #tpu.dimension_semantics<arbitrary>], iteration_bounds = array<i64: 1, 1, 1>, scalar_prefetch = 0 : i64, scratch_operands = 1 : i64, tpu.core_type = #tpu.core_type<tc>, window_params = [{transform_indices = @transform_0, window_bounds = array<i64: 16, 128>}, {transform_indices = @transform_1, window_bounds = array<i64: 128, 32>}, {transform_indices = @transform_2, window_bounds = array<i64: 1, 32>}, {transform_indices = @transform_3, window_bounds = array<i64: 16, 32>}, {transform_indices = @transform_4, window_bounds = array<i64: 16, 32>}]} {
    %c0_i32 = arith.constant 0 : i32
    %0 = arith.cmpi eq, %arg2, %c0_i32 : i32
    %1 = arith.extui %0 : i1 to i32
    %c0_i32_0 = arith.constant 0 : i32
    %2 = arith.cmpi ne, %1, %c0_i32_0 : i32
    scf.if %2 {
      %cst_10 = arith.constant 0.000000e+00 : f32
      %12 = vector.broadcast %cst_10 : f32 to vector<16x32xf32>
      %c0_11 = arith.constant 0 : index
      %c0_12 = arith.constant 0 : index
      %13 = vector.load %arg8[%c0_11, %c0_12] : memref<16x32xf32, #tpu.memory_space<vmem>>, vector<16x32xf32>
      tpu.vector_store %arg8[%c0_11, %c0_12], %12 {strides = array<i32>} : memref<16x32xf32, #tpu.memory_space<vmem>>, vector<16x32xf32>,
    } else {
    }
    %c0 = arith.constant 0 : index
    %c0_1 = arith.constant 0 : index
    %3 = vector.load %arg8[%c0, %c0_1] : memref<16x32xf32, #tpu.memory_space<vmem>>, vector<16x32xf32>
    %c0_2 = arith.constant 0 : index
    %c0_3 = arith.constant 0 : index
    %4 = vector.load %arg3[%c0_2, %c0_3] : memref<16x128xbf16, #tpu.memory_space<vmem>>, vector<16x128xbf16>
    %c0_4 = arith.constant 0 : index
    %c0_5 = arith.constant 0 : index
    %5 = vector.load %arg4[%c0_4, %c0_5] : memref<128x32xbf16, #tpu.memory_space<vmem>>, vector<128x32xbf16>
    %cst = arith.constant dense<0.000000e+00> : vector<16x32xf32>
    %6 = tpu.matmul %4, %5, %cst {dimension_numbers = #tpu.dot_dimension_numbers<[1], [0], [0], [1], [0, 0, 1, 1], [], []>} : vector<16x128xbf16>, vector<128x32xbf16>, vector<16x32xf32> -> vector<16x32xf32>
    %7 = arith.addf %3, %6 : vector<16x32xf32>
    %c0_6 = arith.constant 0 : index
    %c0_7 = arith.constant 0 : index
    %8 = vector.load %arg8[%c0_6, %c0_7] : memref<16x32xf32, #tpu.memory_space<vmem>>, vector<16x32xf32>
    tpu.vector_store %arg8[%c0_6, %c0_7], %7 {strides = array<i32>} : memref<16x32xf32, #tpu.memory_space<vmem>>, vector<16x32xf32>,
    %c0_i32_8 = arith.constant 0 : i32
    %9 = arith.cmpi eq, %arg2, %c0_i32_8 : i32
    %10 = arith.extui %9 : i1 to i32
    %c0_i32_9 = arith.constant 0 : i32
    %11 = arith.cmpi ne, %10, %c0_i32_9 : i32
    scf.if %11 {
      %c0_10 = arith.constant 0 : index
      %c0_11 = arith.constant 0 : index
      %12 = vector.load %arg8[%c0_10, %c0_11] : memref<16x32xf32, #tpu.memory_space<vmem>>, vector<16x32xf32>
      %c0_12 = arith.constant 0 : index
      %c0_13 = arith.constant 0 : index
      %13 = vector.load %arg5[%c0_12, %c0_13] : memref<1x32xf32, #tpu.memory_space<vmem>>, vector<1x32xf32>
      %14 = vector.broadcast %13 : vector<1x32xf32> to vector<16x32xf32>
      %15 = arith.addf %12, %14 : vector<16x32xf32>
      %c0_14 = arith.constant 0 : index
      %c0_15 = arith.constant 0 : index
      %16 = vector.load %arg6[%c0_14, %c0_15] : memref<16x32xf32, #tpu.memory_space<vmem>>, vector<16x32xf32>
      %17 = arith.addf %15, %16 : vector<16x32xf32>
      %c0_16 = arith.constant 0 : index
      %c0_17 = arith.constant 0 : index
      %18 = vector.load %arg7[%c0_16, %c0_17] : memref<16x32xf32, #tpu.memory_space<vmem>>, vector<16x32xf32>
      tpu.vector_store %arg7[%c0_16, %c0_17], %17 {strides = array<i32>} : memref<16x32xf32, #tpu.memory_space<vmem>>, vector<16x32xf32>,
    } else {
    }
    return
  }
  func.func @transform_0(%arg0: i32, %arg1: i32, %arg2: i32) -> (i32, i32) {
    %c0_i32 = arith.constant 0 : i32
    return %arg0, %arg2 : i32, i32
  }
  func.func @transform_1(%arg0: i32, %arg1: i32, %arg2: i32) -> (i32, i32) {
    %c0_i32 = arith.constant 0 : i32
    return %arg2, %arg1 : i32, i32
  }
  func.func @transform_2(%arg0: i32, %arg1: i32, %arg2: i32) -> (i32, i32) {
    %c0_i32 = arith.constant 0 : i32
    %c0_i32_0 = arith.constant 0 : i32
    return %c0_i32, %arg1 : i32, i32
  }
  func.func @transform_3(%arg0: i32, %arg1: i32, %arg2: i32) -> (i32, i32) {
    %c0_i32 = arith.constant 0 : i32
    return %arg0, %arg1 : i32, i32
  }
  func.func @transform_4(%arg0: i32, %arg1: i32, %arg2: i32) -> (i32, i32) {
    %c0_i32 = arith.constant 0 : i32
    return %arg0, %arg1 : i32, i32
  }
}

</mosaic_0001>

<bundles_post_ra>
// kernel: _lambda_.5
= control target key start
LH: loop header
LB: loop body
LE: loop exit
PB: predicated region body
PF: predicated region fallthrough
CT: control target
= control target key end

     0   :  { %vm23_vm0 = vcmask 261120   ;;  %v155_v4 = vmov 32.0   ;;  %vm127_vm8 = vcmask 781312   ;;  %s218_s0 = inlined_call_operand.vmem [shape: f32[16,32], index: 0, kind: input, shape index: {}]   ;;  %s219_s1 = inlined_call_operand.vmem [shape: f32[1,32], index: 1, kind: input, shape index: {}]   ;;  %s220_s2 = inlined_call_operand.vmem [shape: f32[1,32], index: 2, kind: input, shape index: {}]   ;;  %s221_s4 = inlined_call_operand.vmem [shape: f32[1,96], index: 4, kind: input, shape index: {}]   ;;  %s222_s3 = inlined_call_operand.vmem [shape: bf16[32,96], index: 3, kind: input, shape index: {}]   ;;  %s223_s5 = inlined_call_operand.vmem [shape: bf16[16,96], index: 5, kind: output, shape index: {}]  }
   0x1   :  { %v21_v0 = vld [vmem:[%s218_s0] sm:$0xff]  ;;  %v22_v2 = vld [vmem:[%s218_s0 + $0x8] sm:$0xff]  ;;  %149 = vrcp.f32 %v155_v4 }
   0x2   :  { %v24_v1 = vsel %vm23_vm0, %v21_v0, 0.0  ;;  %v27_v3 = vsel %vm23_vm0, %v22_v2, 0.0  ;;  %v144_v21 = vld [vmem:[%s222_s3 + $0x8] sm:$0xff]  ;;  %v143_v23 = vld [vmem:[%s222_s3] sm:$0xff] }
   0x3   :  { %25 = vadd.xlane.f32.xlu0 %v24_v1  ;;  %117 = vmatpush.bf16.msra.mxu0 %v144_v21  ;;  %v146_v42 = vld [vmem:[%s219_s1] ss:$0 sm:$0xff] }
   0x4   :  { %v147_v47 = vld [vmem:[%s220_s2] ss:$0 sm:$0xff] }
   0x5   :  { %v148_v52 = vld [vmem:[%s221_s4] ss:$0 sm:$0xff] }
   0x7   :  { %v150_v5 = vpop.eup %149  ;;  %118 = vmatpush.bf16.msra.mxu0 %v143_v23 }
   0x8   :  { %v31_v6 = vmul.f32 32.0, %v150_v5  ;;  %vm35_vm1 = vweird.f32 %v150_v5 }
   0xa   :  { %v32_v7 = vsub.f32 1.0, %v31_v6 }
   0xb   :  { %28 = vadd.xlane.f32.xlu0 %v27_v3 }
   0xc   :  { %v33_v8 = vmul.f32 %v150_v5, %v32_v7 }
   0xe   :  { %v34_v9 = vadd.f32 %v150_v5, %v33_v8 }
  0x10   :  { %v36_v10 = vsel %vm35_vm1, %v150_v5, %v34_v9 }
  0x76   :  { %v26_v11 = vpop.xlane.xlu0 %25 }
  0x77   :  { %v37_v12 = vmul.f32 %v36_v10, %v26_v11 }
  0x79   :  { %v39_v13 = vsub.f32 %v21_v0, %v37_v12 }
  0x7b   :  { %v41_v14 = vmul.f32 %v39_v13, %v39_v13 }
  0x7d   :  { %v43_v15 = vsel %vm23_vm0, %v41_v14, 0.0 }
  0x7e   :  { %44 = vadd.xlane.f32.xlu1 %v43_v15  ;;  %v29_v16 = vpop.xlane.xlu0 %28 }
  0x7f   :  { %v38_v17 = vmul.f32 %v36_v10, %v29_v16 }
  0x81   :  { %v40_v18 = vsub.f32 %v22_v2, %v38_v17 }
  0x83   :  { %v42_v19 = vmul.f32 %v40_v18, %v40_v18 }
  0x85   :  { %v46_v20 = vsel %vm23_vm0, %v42_v19, 0.0 }
  0x86   :  { %47 = vadd.xlane.f32.xlu1 %v46_v20 }
  0xf1   :  { %v45_v22 = vpop.xlane.xlu1 %44 }
  0xf2   :  { %v49_v24 = vmul.f32 %v45_v22, %v36_v10 }
  0xf4   :  { %v51_v25 = vadd.f32 1e-05, %v49_v24 }
  0xf6   :  { %151 = vrsqrt.f32 %v51_v25  ;;  %vm59_vm3 = vweird.f32 %v51_v25 }
  0xf9   :  { %v48_v26 = vpop.xlane.xlu1 %47 }
  0xfa   :  { %v50_v27 = vmul.f32 %v48_v26, %v36_v10 }
  0xfc   :  { %v152_v28 = vpop.eup %151  ;;  %v52_v29 = vadd.f32 1e-05, %v50_v27 }
  0xfd   :  { %v54_v30 = vmul.f32 %v152_v28, %v51_v25  ;;  %vm60_vm2 = vweird.f32 %v152_v28 }
  0xfe   :  { %153 = vrsqrt.f32 %v52_v29  ;;  %vm61_vm4 = vmor %vm59_vm3, %vm60_vm2  ;;  %vm69_vm6 = vweird.f32 %v52_v29 }
  0xff   :  { %v55_v31 = vmul.f32 %v152_v28, %v54_v30 }
 0x101   :  { %v56_v32 = vmul.f32 0.5, %v55_v31 }
 0x103   :  { %v57_v33 = vsub.f32 1.5, %v56_v32 }
 0x104   :  { %v154_v34 = vpop.eup %153 }
 0x105   :  { %v58_v35 = vmul.f32 %v152_v28, %v57_v33  ;;  %v64_v36 = vmul.f32 %v154_v34, %v52_v29  ;;  %vm70_vm5 = vweird.f32 %v154_v34 }
 0x106   :  { %vm71_vm7 = vmor %vm69_vm6, %vm70_vm5 }
 0x107   :  { %v65_v37 = vmul.f32 %v154_v34, %v64_v36  ;;  %v62_v38 = vsel %vm61_vm4, %v152_v28, %v58_v35 }
 0x108   :  { %v73_v41 = vmul.f32 %v62_v38, %v39_v13 }
 0x109   :  { %v66_v39 = vmul.f32 0.5, %v65_v37 }
 0x10a   :  { %v79_v46 = vmul.f32 %v146_v42, %v73_v41 }
 0x10b   :  { %v67_v40 = vsub.f32 1.5, %v66_v39 }
 0x10c   :  { %v85_v49 = vadd.f32 %v147_v47, %v79_v46 }
 0x10d   :  { %v68_v43 = vmul.f32 %v154_v34, %v67_v40 }
 0x10f   :  { %v72_v44 = vsel %vm71_vm7, %v154_v34, %v68_v43 }
 0x110   :  { %v74_v45 = vmul.f32 %v72_v44, %v40_v18 }
 0x112   :  { %v80_v48 = vmul.f32 %v146_v42, %v74_v45 }
 0x114   :  { %v86_v50 = vadd.f32 %v147_v47, %v80_v48 }
 0x116   :  { %v87_v51 = vpack.c.bf16 %v86_v50, %v85_v49 }
 0x118   :  { %142 = vmatmul.msk.bf16.vlgmr.msra.gmra.mxu0 %vm23_vm0, %v87_v51 }
 0x195   :  { %v120_v53 = vpop.f32.mrf.mxu0 }
 0x196   :  { %v121_v54 = vadd.f32 %v148_v52, %v120_v53 }
 0x198   :  { %v125_v55 = vpack.c.bf16 %v121_v54, %v121_v54 }
 0x19a   :  { %128 = vst.msk [vmem:[%s223_s5] sm:$0xf] %vm127_vm8, %v125_v55 }
 0x19d   :  { %v122_v56 = vpop.f32.mrf.mxu0 }
 0x19e   :  { %v123_v57 = vadd.f32 %v148_v52, %v122_v56 }
 0x1a0   :  { %v126_v58 = vpack.c.bf16 %v123_v57, %v123_v57 }
 0x1a2   :  { %129 = vst.msk [vmem:[%s223_s5 + $0x4] sm:$0xf] %vm127_vm8, %v126_v58 }

// kernel: _lambda_.7
= control target key start
LH: loop header
LB: loop body
LE: loop exit
PB: predicated region body
PF: predicated region fallthrough
CT: control target
= control target key end

     0   :  { %vm22_vm0 = vcmask 261120   ;;  %v111_v1 = vmov 0.0   ;;  %s168_s1 = inlined_call_operand.vmem [shape: bf16[32,32], index: 1, kind: input, shape index: {}]   ;;  %s169_s2 = inlined_call_operand.vmem [shape: f32[1,32], index: 2, kind: input, shape index: {}]   ;;  %s170_s0 = inlined_call_operand.vmem [shape: bf16[16,32], index: 0, kind: input, shape index: {}]   ;;  %s171_s3 = inlined_call_operand.vmem [shape: f32[16,32], index: 3, kind: input, shape index: {}]   ;;  %s172_s4 = inlined_call_operand.vmem [shape: f32[16,32], index: 4, kind: output, shape index: {}]  }
   0x1   :  { %v108_v0 = vld [vmem:[%s168_s1 + $0x8] sm:$0xff]  ;;  %23 = vst.msk [vmem:[#allocation2] sm:$0xff] %vm22_vm0, %v111_v1  ;;  %v107_v2 = vld [vmem:[%s168_s1] sm:$0xff] }
   0x2   :  { %24 = vst.msk [vmem:[#allocation2 + $0x8] sm:$0xff] %vm22_vm0, %v111_v1  ;;  %60 = vmatpush.bf16.msra.mxu0 %v108_v0  ;;  %v106_v3 = vld [vmem:[%s170_s0] sm:$0xff]  ;;  %v84_v16 = vld [vmem:[%s171_s3 + $0x8] sm:$0xff] }
   0x3   :  { %v110_v8 = vld [vmem:[%s169_s2] ss:$0 sm:$0xff] }
   0x4   :  { %v83_v12 = vld [vmem:[%s171_s3] sm:$0xff] }
   0x6   :  { %61 = vmatpush.bf16.msra.mxu0 %v107_v2 }
   0x8   :  { %v25_v4 = vld [vmem:[#allocation2] sm:$0xff] }
   0x9   :  { %105 = vmatmul.msk.bf16.vlgmr.msra.gmra.mxu0 %vm22_vm0, %v106_v3  ;;  %v26_v7 = vld [vmem:[#allocation2 + $0x8] sm:$0xff] }
  0x86   :  { %v63_v5 = vpop.f32.mrf.mxu0 }
  0x87   :  { %v68_v6 = vadd.f32 %v63_v5, %v25_v4 }
  0x89   :  { %70 = vst.msk [vmem:[#allocation2] sm:$0xff] %vm22_vm0, %v68_v6 }
  0x8e   :  { %v65_v9 = vpop.f32.mrf.mxu0 }
  0x8f   :  { %v69_v10 = vadd.f32 %v65_v9, %v26_v7 }
  0x90   :  { %v75_v11 = vld [vmem:[#allocation2] sm:$0xff] }
  0x91   :  { %v81_v13 = vadd.f32 %v110_v8, %v75_v11  ;;  %71 = vst.msk [vmem:[#allocation2 + $0x8] sm:$0xff] %vm22_vm0, %v69_v10 }
  0x93   :  { %v85_v14 = vadd.f32 %v83_v12, %v81_v13 }
  0x95   :  { %87 = vst.msk [vmem:[%s172_s4] sm:$0xff] %vm22_vm0, %v85_v14 }
  0x98   :  { %v76_v15 = vld [vmem:[#allocation2 + $0x8] sm:$0xff] }
  0x99   :  { %v82_v17 = vadd.f32 %v110_v8, %v76_v15 }
  0x9b   :  { %v86_v18 = vadd.f32 %v84_v16, %v82_v17 }
  0x9d   :  { %88 = vst.msk [vmem:[%s172_s4 + $0x8] sm:$0xff] %vm22_vm0, %v86_v18 }

// kernel: _lambda_.6
= control target key start
LH: loop header
LB: loop body
LE: loop exit
PB: predicated region body
PF: predicated region fallthrough
CT: control target
= control target key end

     0   :  { %s1075_s15 = smov 0   ;;  %s1077_s16 = smov 0   ;;  %s1224_s0 = inlined_call_operand.vmem [shape: bf16[2,4,8,8], index: 0, kind: input, shape index: {}]   ;;  %s1225_s1 = inlined_call_operand.vmem [shape: bf16[2,4,8,8], index: 1, kind: input, shape index: {}]   ;;  %s1226_s2 = inlined_call_operand.vmem [shape: bf16[2,4,8,8], index: 2, kind: input, shape index: {}]   ;;  %s1227_s3 = inlined_call_operand.vmem [shape: f32[8,8], index: 3, kind: input, shape index: {}]   ;;  %s1228_s4 = inlined_call_operand.vmem [shape: bf16[2,4,8,8], index: 4, kind: output, shape index: {}]  }
   0x1   :  { %s1079_s17 = smov 0  }
   0x2 LB: > { %s40_s18 = sadd.s32 1, %s1041_s16  ;;  %p945_p0 = scmp.ge.s32.totalorder %s1045_s17, 1  ;;  %s1045_s17 = sphi %s1079_s17, %s14_s17   ;;  %s1041_s16 = sphi %s1077_s16, %s1230_s16   ;;  %s1037_s15 = sphi %s1075_s15, %s1229_s15  }
   0x3   : > { %p42_p1 = scmp.ge.s32.totalorder %s40_s18, 2  ;;  %p262_p2 = scmp.lt.s32.totalorder %s1045_s17, 3 }
   0x5   : > { %s1232_s18 = smov (%p42_p1, %s40_s18), 0  ;;  %p263_p3 = pnand %p945_p0, %p262_p2 }
   0x6   : > { %p334_p4 = scmp.lt.s32.totalorder (!%p263_p3), %s1037_s15, 1 }
   0x7   : > { %266 = sbr.rel (%p263_p3) target bundleno = 702 (0x2be), region = 36 }
   0xc   : > { %s1234_s15 = smov (!%p334_p4, %s1037_s15), 1  ;;  %vm406_vm0 = vcmask 64512   ;;  %vm397_vm1 = vcmask 7168   ;;  %v1047_v12 = vmov -inf   ;;  %v423_v13 = vld [vmem:[%s1227_s3] sm:$0xff]  ;;  %v1048_v37 = vmov 0  }
   0xd   : > { %s1093_s19 = sshll.u32 %s1234_s15, 4  ;;  %398 = vst.msk [vmem:[#allocation2] sm:$0xff] %vm397_vm1, %v1047_v12  ;;  %v425_v14 = vmul.f32 10000.0, %v423_v13  ;;  %v424_v15 = vmul.f32 0.35355338, %v423_v13  ;;  %997 = vset.pattern.permute.xlu0 %v1048_v37  ;;  %996 = vset.pattern.permute.xlu2 %v1048_v37  ;;  %v1049_v38 = vmov 0.0  }
   0xe   : > { %s357_s22 = scalar_lea.vmem %s1225_s1, %s1093_s19  ;;  %s344_s25 = scalar_lea.vmem %s1224_s0, %s1093_s19  ;;  %399 = vst.msk [vmem:[#allocation2 + $0x8] sm:$0xff] %vm397_vm1, %v1047_v12  ;;  %998 = vset.pattern.permute.xlu1 %v1048_v37  ;;  %vm640_vm2 = vcmask 1043456   ;;  %vm769_vm3 = vcmask 60416  }
   0xf   : > { %v415_v0 = vld [vmem:[%s357_s22] sm:$0xf]  ;;  %v417_v1 = vld [vmem:[%s357_s22 + $0x8] sm:$0xf]  ;;  %v416_v4 = vld [vmem:[%s357_s22 + $0x4] sm:$0xf]  ;;  %s370_s30 = scalar_lea.vmem %s1226_s2, %s1093_s19  ;;  %s390_s7 = scalar_lea.vmem %s1228_s4, %s1093_s19 }
  0x10   : > { %v432_v2 = vsel %vm406_vm0, %v415_v0, 0  ;;  %v470_v3 = vsel %vm406_vm0, %v417_v1, 0  ;;  %v451_v5 = vsel %vm406_vm0, %v416_v4, 0  ;;  %v418_v6 = vld [vmem:[%s357_s22 + $0xc] sm:$0xf]  ;;  %400 = vst.msk [vmem:[#allocation2 + $0x10] sm:$0xff] %vm397_vm1, %v1047_v12 }
  0x11   : > { %441 = vmatpush.bf16.xpose.msra.mxu0 %v432_v2  ;;  %479 = vmatpush.bf16.xpose.msra.mxu2 %v470_v3  ;;  %v489_v7 = vsel %vm406_vm0, %v418_v6, 0  ;;  %v411_v8 = vld [vmem:[%s344_s25] sm:$0xf]  ;;  %v413_v9 = vld [vmem:[%s344_s25 + $0x8] sm:$0xf]  ;;  %401 = vst.msk [vmem:[#allocation2 + $0x18] sm:$0xff] %vm397_vm1, %v1047_v12 }
  0x12   : > { %460 = vmatpush.bf16.xpose.msra.mxu1 %v451_v5  ;;  %498 = vmatpush.bf16.xpose.msra.mxu3 %v489_v7  ;;  %v412_v10 = vld [vmem:[%s344_s25 + $0x4] sm:$0xf]  ;;  %v414_v11 = vld [vmem:[%s344_s25 + $0xc] sm:$0xf]  ;;  %v954_v16 = vadd.f32 -10000.0, %v425_v14  ;;  %404 = vst.msk [vmem:[#allocation3 + $0x10] sm:$0xff] %vm397_vm1, %v1049_v38 }
  0x13   : > { %402 = vst.msk [vmem:[#allocation3] sm:$0xff] %vm397_vm1, %v1049_v38  ;;  %v421_v55 = vld [vmem:[%s370_s30 + $0x8] sm:$0xf]  ;;  %v422_v57 = vld [vmem:[%s370_s30 + $0xc] sm:$0xf] }
  0x14   : > { %403 = vst.msk [vmem:[#allocation3 + $0x8] sm:$0xff] %vm397_vm1, %v1049_v38  ;;  %v1142_v39 = vld [vmem:[#allocation2] sm:$0xff]  ;;  %v680_v56 = vsel %vm640_vm2, %v421_v55, 0  ;;  %v699_v58 = vsel %vm640_vm2, %v422_v57, 0 }
  0x15   : > { %405 = vst.msk [vmem:[#allocation3 + $0x18] sm:$0xff] %vm397_vm1, %v1049_v38  ;;  %v1154_v45 = vld [vmem:[#allocation2 + $0x8] sm:$0xff]  ;;  %v419_v59 = vld [vmem:[%s370_s30] sm:$0xf]  ;;  %v420_v62 = vld [vmem:[%s370_s30 + $0x4] sm:$0xf] }
  0x16   : > { %407 = vst.msk [vmem:[#allocation4] sm:$0xff] %vm406_vm0, %v1049_v38  ;;  %v642_v60 = vsel %vm640_vm2, %v419_v59, 0  ;;  %v661_v0 = vsel %vm640_vm2, %v420_v62, 0 }
  0x17   : > { %408 = vst.msk [vmem:[#allocation4 + $0x8] sm:$0xff] %vm406_vm0, %v1049_v38  ;;  %v1152_v43 = vld [vmem:[#allocation2 + $0x10] sm:$0xff] }
  0x18   : > { %955 = vmatmul.msk.bf16.vlgmr.msra.gmra.mxu0 %vm406_vm0, %v411_v8  ;;  %957 = vmatmul.msk.bf16.vlgmr.msra.gmra.mxu2 %vm406_vm0, %v413_v9  ;;  %409 = vst.msk [vmem:[#allocation4 + $0x10] sm:$0xff] %vm406_vm0, %v1049_v38  ;;  %v1167_v51 = vld [vmem:[#allocation2 + $0x18] sm:$0xff] }
  0x19   : > { %956 = vmatmul.msk.bf16.vlgmr.msra.gmra.mxu1 %vm406_vm0, %v412_v10  ;;  %958 = vmatmul.msk.bf16.vlgmr.msra.gmra.mxu3 %vm406_vm0, %v414_v11  ;;  %410 = vst.msk [vmem:[#allocation4 + $0x18] sm:$0xff] %vm406_vm0, %v1049_v38 }
  0x1a   : > { %689 = vmatpush.bf16.msrb.mxu2 %v680_v56  ;;  %708 = vmatpush.bf16.msrb.mxu3 %v699_v58 }
  0x1b   : > { %651 = vmatpush.bf16.msrb.mxu0 %v642_v60  ;;  %670 = vmatpush.bf16.msrb.mxu1 %v661_v0 }
  0x95   : > { %v443_v17 = vpop.f32.mrf.mxu0 }
  0x96   : > { %v504_v18 = vmul.f32 %v443_v17, %v424_v15  ;;  %v462_v19 = vpop.f32.mrf.mxu1 }
  0x97   : > { %v505_v21 = vmul.f32 %v462_v19, %v424_v15 }
  0x98   : > { %v1118_v20 = vadd.f32 %v954_v16, %v504_v18 }
  0x99   : > { %v1122_v25 = vadd.f32 %v954_v16, %v505_v21 }
  0x9a   : > { %v516_v22 = vsel %vm406_vm0, %v1118_v20, -inf }
  0x9b   : > { %v481_v23 = vpop.f32.mrf.mxu2  ;;  %517 = vmax.xlane.f32.xlu1 %v516_v22  ;;  %v519_v32 = vsel %vm406_vm0, %v1122_v25, -inf }
  0x9c   : > { %v506_v24 = vmul.f32 %v481_v23, %v424_v15  ;;  %v500_v27 = vpop.f32.mrf.mxu3 }
  0x9d   : > { %v445_v26 = vpop.f32.mrf.mxu0  ;;  %v507_v29 = vmul.f32 %v500_v27, %v424_v15 }
  0x9e   : > { %v1124_v28 = vadd.f32 %v954_v16, %v506_v24  ;;  %v464_v30 = vpop.f32.mrf.mxu1 }
  0x9f   : > { %v1130_v33 = vadd.f32 %v954_v16, %v507_v29  ;;  %v578_v30 = vld [vmem:[#allocation3 + $0x10] sm:$0xff] }
  0xa0   : > { %v522_v31 = vsel %vm406_vm0, %v1124_v28, -inf }
  0xa1   : > { %523 = vmax.xlane.f32.xlu0 %v522_v31  ;;  %v525_v36 = vsel %vm406_vm0, %v1130_v33, -inf }
  0xa3   : > { %520 = vmax.xlane.f32.xlu1 %v519_v32  ;;  %v483_v34 = vpop.f32.mrf.mxu2 }
  0xa4   : > { %v502_v35 = vpop.f32.mrf.mxu3 }
  0xa9   : > { %526 = vmax.xlane.f32.xlu0 %v525_v36  ;;  %v576_v36 = vld [vmem:[#allocation3] sm:$0xff] }
 0x10e   : > { %v518_v40 = vpop.xlane.xlu1 %517 }
 0x10f   : > { %v1145_v41 = vmax.f32 %v1142_v39, %v518_v40 }
 0x111   : > { %v532_v42 = vsub.f32 %v1142_v39, %v1145_v41  ;;  %722 = vst.msk [vmem:[#allocation2] sm:$0xff] %vm397_vm1, %v1145_v41  ;;  %546 = vperm.xlu0 %997, %v1145_v41  }
 0x113   : > { %v536_v22 = vmul.f32 1.442695, %v532_v42  ;;  %v577_v42 = vld [vmem:[#allocation3 + $0x8] sm:$0xff] }
 0x114   : > { %v524_v44 = vpop.xlane.xlu0 %523 }
 0x115   : > { %v1157_v46 = vmax.f32 %v1152_v43, %v524_v44 }
 0x116   : > { %v521_v47 = vpop.xlane.xlu1 %520 }
 0x117   : > { %v534_v48 = vsub.f32 %v1152_v43, %v1157_v46  ;;  %724 = vst.msk [vmem:[#allocation2 + $0x10] sm:$0xff] %vm397_vm1, %v1157_v46  ;;  %v529_v49 = vmax.f32 %v1154_v45, %v521_v47  ;;  %556 = vperm.xlu2 %996, %v1157_v46   ;;  %v605_v43 = vld [vmem:[#allocation4] sm:$0xff] }
 0x119   : > { %v533_v50 = vsub.f32 %v1154_v45, %v529_v49  ;;  %723 = vst.msk [vmem:[#allocation2 + $0x8] sm:$0xff] %vm397_vm1, %v529_v49  ;;  %551 = vperm.xlu1 %998, %v529_v49   ;;  %v540_v23 = vmul.f32 1.442695, %v534_v48 }
 0x11b   : > { %v538_v24 = vmul.f32 1.442695, %v533_v50 }
 0x11c   : > { %v527_v52 = vpop.xlane.xlu0 %526 }
 0x11d   : > { %v1170_v53 = vmax.f32 %v1167_v51, %v527_v52 }
 0x11f   : > { %v535_v54 = vsub.f32 %v1167_v51, %v1170_v53  ;;  %725 = vst.msk [vmem:[#allocation2 + $0x18] sm:$0xff] %vm397_vm1, %v1170_v53  ;;  %561 = vperm.xlu2 %996, %v1170_v53  }
 0x121   : > { %v542_v29 = vmul.f32 1.442695, %v535_v54  ;;  %v607_v54 = vld [vmem:[#allocation4 + $0x10] sm:$0xff] }
 0x171   : > { %v557_v61 = vpop.permute.xlu2 %556 }
 0x172   : > { %v566_v63 = vsub.f32 %v1124_v28, %v557_v61 }
 0x174   : > { %v572_v1 = vmul.f32 1.442695, %v566_v63 }
 0x176   : > { %999 = vpow2.f32 %v572_v1  ;;  %v606_v1 = vld [vmem:[#allocation4 + $0x8] sm:$0xff] }
 0x179   : > { %v562_v2 = vpop.permute.xlu2 %561 }
 0x17a   : > { %v567_v3 = vsub.f32 %v1130_v33, %v562_v2 }
 0x17c   : > { %v1000_v4 = vpop.eup %999  ;;  %v574_v5 = vmul.f32 1.442695, %v567_v3 }
 0x17d   : > { %v590_v6 = vsel %vm406_vm0, %v1000_v4, 0.0  ;;  %v635_v7 = vpack.c.bf16 %v1000_v4, %v1000_v4 }
 0x17e   : > { %1001 = vpow2.f32 %v574_v5  ;;  %591 = vadd.xlane.f32.xlu0 %v590_v6  ;;  %v579_v5 = vld [vmem:[#allocation3 + $0x18] sm:$0xff] }
 0x17f   : > { %961 = vmatmul.msk.bf16.vlgmr.msrb.gmra.mxu2 %vm406_vm0, %v635_v7 }
 0x183   : > { %v547_v8 = vpop.permute.xlu0 %546 }
 0x184   : > { %v1002_v9 = vpop.eup %1001  ;;  %v564_v10 = vsub.f32 %v1118_v20, %v547_v8 }
 0x185   : > { %v636_v11 = vpack.c.bf16 %v1002_v9, %v1002_v9  ;;  %v593_v28 = vsel %vm406_vm0, %v1002_v9, 0.0  ;;  %v608_v9 = vld [vmem:[#allocation4 + $0x18] sm:$0xff] }
 0x186   : > { %v568_v12 = vmul.f32 1.442695, %v564_v10 }
 0x187   : > { %962 = vmatmul.msk.bf16.vlgmr.msrb.gmra.mxu3 %vm406_vm0, %v636_v11 }
 0x188   : > { %1003 = vpow2.f32 %v568_v12 }
 0x18b   : > { %v552_v13 = vpop.permute.xlu1 %551 }
 0x18c   : > { %v565_v14 = vsub.f32 %v1122_v25, %v552_v13 }
 0x18e   : > { %v1004_v15 = vpop.eup %1003  ;;  %v570_v16 = vmul.f32 1.442695, %v565_v14 }
 0x18f   : > { %v584_v17 = vsel %vm406_vm0, %v1004_v15, 0.0  ;;  %v633_v18 = vpack.c.bf16 %v1004_v15, %v1004_v15 }
 0x190   : > { %1005 = vpow2.f32 %v570_v16  ;;  %585 = vadd.xlane.f32.xlu2 %v584_v17 }
 0x191   : > { %959 = vmatmul.msk.bf16.vlgmr.msrb.gmra.mxu0 %vm406_vm0, %v633_v18  ;;  %1007 = vpow2.f32 %v536_v22 }
 0x192   : > { %1009 = vpow2.f32 %v540_v23 }
 0x193   : > { %1011 = vpow2.f32 %v538_v24 }
 0x194   : > { %1013 = vpow2.f32 %v542_v29 }
 0x196   : > { %v1006_v19 = vpop.eup %1005 }
 0x197   : > { %v587_v20 = vsel %vm406_vm0, %v1006_v19, 0.0  ;;  %v634_v21 = vpack.c.bf16 %v1006_v19, %v1006_v19  ;;  %v1008_v25 = vpop.eup %1007 }
 0x198   : > { %588 = vadd.xlane.f32.xlu1 %v587_v20  ;;  %v1010_v26 = vpop.eup %1009  ;;  %v580_v39 = vmul.f32 %v1008_v25, %v576_v36 }
 0x199   : > { %960 = vmatmul.msk.bf16.vlgmr.msrb.gmra.mxu1 %vm406_vm0, %v634_v21  ;;  %v1012_v27 = vpop.eup %1011  ;;  %v582_v32 = vmul.f32 %v1010_v26, %v578_v30 }
 0x19a   : > { %v1014_v31 = vpop.eup %1013  ;;  %v581_v46 = vmul.f32 %v1012_v27, %v577_v42 }
 0x19b   : > { %v583_v6 = vmul.f32 %v1014_v31, %v579_v5 }
 0x1a8   : > { %611 = vperm.xlu2 %996, %v1008_v25  }
 0x1b0   : > { %621 = vperm.xlu2 %996, %v1010_v26  }
 0x1b1   : > { %616 = vperm.xlu1 %998, %v1012_v27  }
 0x1d9   : > { %594 = vadd.xlane.f32.xlu2 %v593_v28 }
 0x1f1   : > { %v592_v33 = vpop.xlane.xlu0 %591  ;;  %626 = vperm.xlu2 %996, %v1014_v31  }
 0x1f2   : > { %v598_v34 = vadd.f32 %v592_v33, %v582_v32 }
 0x1f4   : > { %603 = vst.msk [vmem:[#allocation3 + $0x10] sm:$0xff] %vm397_vm1, %v598_v34 }
 0x1fb   : > { %v735_v35 = vld [vmem:[#allocation3 + $0x10] sm:$0xff] }
 0x1fc   : > { %1015 = vrcp.f32 %v735_v35 }
 0x202   : > { %v1016_v37 = vpop.eup %1015  ;;  %v691_v38 = vpop.f32.mrf.mxu2 }
 0x203   : > { %v586_v40 = vpop.xlane.xlu2 %585  ;;  %753 = vperm.xlu1 %998, %v1016_v37  }
 0x204   : > { %v596_v41 = vadd.f32 %v586_v40, %v580_v39 }
 0x206   : > { %601 = vst.msk [vmem:[#allocation3] sm:$0xff] %vm397_vm1, %v596_v41 }
 0x20a   : > { %v693_v44 = vpop.f32.mrf.mxu2  ;;  %v710_v45 = vpop.f32.mrf.mxu3 }
 0x20b   : > { %v612_v47 = vpop.permute.xlu2 %611  ;;  %v589_v48 = vpop.xlane.xlu1 %588 }
 0x20c   : > { %v629_v49 = vmul.f32 %v612_v47, %v605_v43  ;;  %v597_v50 = vadd.f32 %v589_v48, %v581_v46 }
 0x20d   : > { %v733_v51 = vld [vmem:[#allocation3] sm:$0xff] }
 0x20e   : > { %602 = vst.msk [vmem:[#allocation3 + $0x8] sm:$0xff] %vm397_vm1, %v597_v50  ;;  %v653_v52 = vpop.f32.mrf.mxu0  ;;  %1017 = vrcp.f32 %v733_v51 }
 0x20f   : > { %v714_v53 = vadd.f32 %v653_v52, %v629_v49 }
 0x211   : > { %718 = vst.msk [vmem:[#allocation4] sm:$0xff] %vm406_vm0, %v714_v53 }
 0x212   : > { %v712_v55 = vpop.f32.mrf.mxu3 }
 0x213   : > { %v622_v56 = vpop.permute.xlu2 %621 }
 0x214   : > { %v1018_v57 = vpop.eup %1017  ;;  %v631_v58 = vmul.f32 %v622_v56, %v607_v54 }
 0x215   : > { %743 = vperm.xlu0 %997, %v1018_v57   ;;  %v734_v59 = vld [vmem:[#allocation3 + $0x8] sm:$0xff] }
 0x216   : > { %v716_v60 = vadd.f32 %v691_v38, %v631_v58  ;;  %v655_v61 = vpop.f32.mrf.mxu0  ;;  %v672_v62 = vpop.f32.mrf.mxu1  ;;  %1019 = vrcp.f32 %v734_v59 }
 0x218   : > { %720 = vst.msk [vmem:[#allocation4 + $0x10] sm:$0xff] %vm406_vm0, %v716_v60  ;;  %v729_v24 = vld [vmem:[#allocation4] sm:$0xff] }
 0x21c   : > { %v1020_v63 = vpop.eup %1019 }
 0x21d   : > { %748 = vperm.xlu2 %996, %v1020_v63  }
 0x21e   : > { %v674_v0 = vpop.f32.mrf.mxu1 }
 0x21f   : > { %v731_v15 = vld [vmem:[#allocation4 + $0x10] sm:$0xff] }
 0x223   : > { %v617_v2 = vpop.permute.xlu1 %616 }
 0x224   : > { %v630_v3 = vmul.f32 %v617_v2, %v606_v1 }
 0x226   : > { %v715_v4 = vadd.f32 %v672_v62, %v630_v3 }
 0x228   : > { %719 = vst.msk [vmem:[#allocation4 + $0x8] sm:$0xff] %vm406_vm0, %v715_v4 }
 0x22f   : > { %v730_v18 = vld [vmem:[#allocation4 + $0x8] sm:$0xff] }
 0x24c   : > { %v595_v7 = vpop.xlane.xlu2 %594 }
 0x24d   : > { %v599_v8 = vadd.f32 %v595_v7, %v583_v6 }
 0x24f   : > { %604 = vst.msk [vmem:[#allocation3 + $0x18] sm:$0xff] %vm397_vm1, %v599_v8 }
 0x254   : > { %v627_v10 = vpop.permute.xlu2 %626 }
 0x255   : > { %v632_v11 = vmul.f32 %v627_v10, %v608_v9 }
 0x256   : > { %v736_v12 = vld [vmem:[#allocation3 + $0x18] sm:$0xff] }
 0x257   : > { %v717_v13 = vadd.f32 %v710_v45, %v632_v11  ;;  %1021 = vrcp.f32 %v736_v12 }
 0x259   : > { %721 = vst.msk [vmem:[#allocation4 + $0x18] sm:$0xff] %vm406_vm0, %v717_v13 }
 0x25d   : > { %v1022_v14 = vpop.eup %1021 }
 0x25e   : > { %758 = vperm.xlu2 %996, %v1022_v14  }
 0x260   : > { %v732_v27 = vld [vmem:[#allocation4 + $0x18] sm:$0xff] }
 0x275   : > { %v754_v16 = vpop.permute.xlu1 %753 }
 0x276   : > { %v763_v17 = vmul.f32 %v754_v16, %v731_v15 }
 0x277   : > { %v749_v19 = vpop.permute.xlu2 %748 }
 0x278   : > { %v767_v20 = vpack.c.bf16 %v763_v17, %v763_v17  ;;  %v762_v21 = vmul.f32 %v749_v19, %v730_v18 }
 0x27a   : > { %772 = vst.msk [vmem:[%s390_s7 + $0x8] sm:$0xf] %vm769_vm3, %v767_v20  ;;  %v766_v22 = vpack.c.bf16 %v762_v21, %v762_v21 }
 0x27c   : > { %771 = vst.msk [vmem:[%s390_s7 + $0x4] sm:$0xf] %vm769_vm3, %v766_v22 }
 0x287   : > { %v744_v23 = vpop.permute.xlu0 %743 }
 0x288   : > { %v761_v25 = vmul.f32 %v744_v23, %v729_v24 }
 0x28a   : > { %v765_v26 = vpack.c.bf16 %v761_v25, %v761_v25 }
 0x28c   : > { %770 = vst.msk [vmem:[%s390_s7] sm:$0xf] %vm769_vm3, %v765_v26 }
 0x2b8   : > { %v759_v28 = vpop.permute.xlu2 %758 }
 0x2b9   : > { %v764_v29 = vmul.f32 %v759_v28, %v732_v27 }
 0x2bb   : > { %v768_v30 = vpack.c.bf16 %v764_v29, %v764_v29 }
 0x2bd   : > { %773 = vst.msk [vmem:[%s390_s7 + $0xc] sm:$0xf] %vm769_vm3, %v768_v30 }
 0x2be PF: > { %s14_s17 = sadd.s32 1, %s1045_s17   ;;  %s1229_s15 = smov %s1041_s16 }
 0x2bf   : > { %p11_p5 = scmp.ge.s32.totalorder %s14_s17, 4   ;;  %s1230_s16 = smov %s1232_s18 }
 0x2c1   :  { %13 = sbr.rel (!%p11_p5) target bundleno = 2 (0x2), region = 83 }

// kernel: _lambda_.8
= control target key start
LH: loop header
LB: loop body
LE: loop exit
PB: predicated region body
PF: predicated region fallthrough
CT: control target
= control target key end

     0   :  { %vm23_vm0 = vcmask 261120   ;;  %v181_v4 = vmov 32.0   ;;  %s241_s0 = inlined_call_operand.vmem [shape: f32[16,32], index: 0, kind: input, shape index: {}]   ;;  %s242_s1 = inlined_call_operand.vmem [shape: f32[1,32], index: 1, kind: input, shape index: {}]   ;;  %s243_s2 = inlined_call_operand.vmem [shape: f32[1,32], index: 2, kind: input, shape index: {}]   ;;  %s244_s4 = inlined_call_operand.vmem [shape: f32[1,128], index: 4, kind: input, shape index: {}]   ;;  %s245_s3 = inlined_call_operand.vmem [shape: bf16[32,128], index: 3, kind: input, shape index: {}]   ;;  %s246_s5 = inlined_call_operand.vmem [shape: bf16[16,128], index: 5, kind: output, shape index: {}]  }
   0x1   :  { %v21_v0 = vld [vmem:[%s241_s0] sm:$0xff]  ;;  %v22_v2 = vld [vmem:[%s241_s0 + $0x8] sm:$0xff]  ;;  %171 = vrcp.f32 %v181_v4 }
   0x2   :  { %v24_v1 = vsel %vm23_vm0, %v21_v0, 0.0  ;;  %v27_v3 = vsel %vm23_vm0, %v22_v2, 0.0  ;;  %v161_v21 = vld [vmem:[%s245_s3 + $0x8] sm:$0xff]  ;;  %v160_v23 = vld [vmem:[%s245_s3] sm:$0xff] }
   0x3   :  { %25 = vadd.xlane.f32.xlu0 %v24_v1  ;;  %117 = vmatpush.bf16.msra.mxu0 %v161_v21  ;;  %v168_v42 = vld [vmem:[%s242_s1] ss:$0 sm:$0xff] }
   0x4   :  { %v169_v47 = vld [vmem:[%s243_s2] ss:$0 sm:$0xff] }
   0x5   :  { %v170_v52 = vld [vmem:[%s244_s4] ss:$0 sm:$0xff] }
   0x7   :  { %v172_v5 = vpop.eup %171  ;;  %118 = vmatpush.bf16.msra.mxu0 %v160_v23 }
   0x8   :  { %v31_v6 = vmul.f32 32.0, %v172_v5  ;;  %vm35_vm1 = vweird.f32 %v172_v5 }
   0xa   :  { %v32_v7 = vsub.f32 1.0, %v31_v6 }
   0xb   :  { %28 = vadd.xlane.f32.xlu0 %v27_v3 }
   0xc   :  { %v33_v8 = vmul.f32 %v172_v5, %v32_v7 }
   0xe   :  { %v34_v9 = vadd.f32 %v172_v5, %v33_v8 }
  0x10   :  { %v36_v10 = vsel %vm35_vm1, %v172_v5, %v34_v9 }
  0x76   :  { %v26_v11 = vpop.xlane.xlu0 %25 }
  0x77   :  { %v37_v12 = vmul.f32 %v36_v10, %v26_v11 }
  0x79   :  { %v39_v13 = vsub.f32 %v21_v0, %v37_v12 }
  0x7b   :  { %v41_v14 = vmul.f32 %v39_v13, %v39_v13 }
  0x7d   :  { %v43_v15 = vsel %vm23_vm0, %v41_v14, 0.0 }
  0x7e   :  { %44 = vadd.xlane.f32.xlu1 %v43_v15  ;;  %v29_v16 = vpop.xlane.xlu0 %28 }
  0x7f   :  { %v38_v17 = vmul.f32 %v36_v10, %v29_v16 }
  0x81   :  { %v40_v18 = vsub.f32 %v22_v2, %v38_v17 }
  0x83   :  { %v42_v19 = vmul.f32 %v40_v18, %v40_v18 }
  0x85   :  { %v46_v20 = vsel %vm23_vm0, %v42_v19, 0.0 }
  0x86   :  { %47 = vadd.xlane.f32.xlu1 %v46_v20 }
  0xf1   :  { %v45_v22 = vpop.xlane.xlu1 %44 }
  0xf2   :  { %v49_v24 = vmul.f32 %v45_v22, %v36_v10 }
  0xf4   :  { %v51_v25 = vadd.f32 1e-05, %v49_v24 }
  0xf6   :  { %173 = vrsqrt.f32 %v51_v25  ;;  %vm59_vm3 = vweird.f32 %v51_v25 }
  0xf9   :  { %v48_v26 = vpop.xlane.xlu1 %47 }
  0xfa   :  { %v50_v27 = vmul.f32 %v48_v26, %v36_v10 }
  0xfc   :  { %v174_v28 = vpop.eup %173  ;;  %v52_v29 = vadd.f32 1e-05, %v50_v27 }
  0xfd   :  { %v54_v30 = vmul.f32 %v174_v28, %v51_v25  ;;  %vm60_vm2 = vweird.f32 %v174_v28 }
  0xfe   :  { %175 = vrsqrt.f32 %v52_v29  ;;  %vm61_vm4 = vmor %vm59_vm3, %vm60_vm2  ;;  %vm69_vm6 = vweird.f32 %v52_v29 }
  0xff   :  { %v55_v31 = vmul.f32 %v174_v28, %v54_v30 }
 0x101   :  { %v56_v32 = vmul.f32 0.5, %v55_v31 }
 0x103   :  { %v57_v33 = vsub.f32 1.5, %v56_v32 }
 0x104   :  { %v176_v34 = vpop.eup %175 }
 0x105   :  { %v58_v35 = vmul.f32 %v174_v28, %v57_v33  ;;  %v64_v36 = vmul.f32 %v176_v34, %v52_v29  ;;  %vm70_vm5 = vweird.f32 %v176_v34 }
 0x106   :  { %vm71_vm7 = vmor %vm69_vm6, %vm70_vm5 }
 0x107   :  { %v65_v37 = vmul.f32 %v176_v34, %v64_v36  ;;  %v62_v38 = vsel %vm61_vm4, %v174_v28, %v58_v35 }
 0x108   :  { %v73_v41 = vmul.f32 %v62_v38, %v39_v13 }
 0x109   :  { %v66_v39 = vmul.f32 0.5, %v65_v37 }
 0x10a   :  { %v79_v46 = vmul.f32 %v168_v42, %v73_v41 }
 0x10b   :  { %v67_v40 = vsub.f32 1.5, %v66_v39 }
 0x10c   :  { %v85_v49 = vadd.f32 %v169_v47, %v79_v46 }
 0x10d   :  { %v68_v43 = vmul.f32 %v176_v34, %v67_v40 }
 0x10f   :  { %v72_v44 = vsel %vm71_vm7, %v176_v34, %v68_v43 }
 0x110   :  { %v74_v45 = vmul.f32 %v72_v44, %v40_v18 }
 0x112   :  { %v80_v48 = vmul.f32 %v168_v42, %v74_v45 }
 0x114   :  { %v86_v50 = vadd.f32 %v169_v47, %v80_v48 }
 0x116   :  { %v87_v51 = vpack.c.bf16 %v86_v50, %v85_v49 }
 0x118   :  { %159 = vmatmul.msk.bf16.vlgmr.msra.gmra.mxu0 %vm23_vm0, %v87_v51 }
 0x195   :  { %v120_v53 = vpop.f32.mrf.mxu0 }
 0x196   :  { %v121_v54 = vadd.f32 %v170_v52, %v120_v53 }
 0x198   :  { %v129_v55 = vmul.f32 0.044715, %v121_v54  ;;  %v127_v59 = vmul.f32 0.7978846, %v121_v54  ;;  %v125_v6 = vmul.f32 0.5, %v121_v54 }
 0x19a   :  { %v131_v56 = vmul.f32 %v129_v55, %v121_v54 }
 0x19c   :  { %v133_v57 = vadd.f32 1.0, %v131_v56 }
 0x19d   :  { %v122_v58 = vpop.f32.mrf.mxu0 }
 0x19e   :  { %v123_v60 = vadd.f32 %v170_v52, %v122_v58  ;;  %v135_v61 = vmul.f32 %v133_v57, %v127_v59 }
 0x1a0   :  { %v130_v62 = vmul.f32 0.044715, %v123_v60  ;;  %177 = vtanh.f32 %v135_v61  ;;  %v128_v0 = vmul.f32 0.7978846, %v123_v60  ;;  %v126_v7 = vmul.f32 0.5, %v123_v60 }
 0x1a2   :  { %v132_v63 = vmul.f32 %v130_v62, %v123_v60 }
 0x1a4   :  { %v134_v1 = vadd.f32 1.0, %v132_v63 }
 0x1a6   :  { %v136_v2 = vmul.f32 %v134_v1, %v128_v0  ;;  %v178_v3 = vpop.eup %177 }
 0x1a7   :  { %v139_v4 = vadd.f32 1.0, %v178_v3 }
 0x1a8   :  { %179 = vtanh.f32 %v136_v2 }
 0x1a9   :  { %v141_v9 = vmul.f32 %v139_v4, %v125_v6 }
 0x1ae   :  { %v180_v5 = vpop.eup %179 }
 0x1af   :  { %v140_v8 = vadd.f32 1.0, %v180_v5 }
 0x1b1   :  { %v142_v10 = vmul.f32 %v140_v8, %v126_v7 }
 0x1b3   :  { %v165_v11 = vpack.c.bf16 %v142_v10, %v141_v9 }
 0x1b5   :  { %166 = vst [vmem:[%s246_s5] sm:$0xff] %v165_v11  }

// kernel: _lambda_.9
= control target key start
LH: loop header
LB: loop body
LE: loop exit
PB: predicated region body
PF: predicated region fallthrough
CT: control target
= control target key end

     0   :  { %vm22_vm0 = vcmask 261120   ;;  %v229_v2 = vmov 0.0   ;;  %s303_s0 = inlined_call_operand.vmem [shape: bf16[16,128], index: 0, kind: input, shape index: {}]   ;;  %s304_s1 = inlined_call_operand.vmem [shape: bf16[128,32], index: 1, kind: input, shape index: {}]   ;;  %s305_s2 = inlined_call_operand.vmem [shape: f32[1,32], index: 2, kind: input, shape index: {}]   ;;  %s306_s3 = inlined_call_operand.vmem [shape: f32[16,32], index: 3, kind: input, shape index: {}]   ;;  %s307_s4 = inlined_call_operand.hbm [shape: f32[16,32], index: 4, kind: output, shape index: {}]  }
   0x1   :  { %v197_v0 = vld [vmem:[%s304_s1 + $0x38] sm:$0xff]  ;;  %v196_v1 = vld [vmem:[%s304_s1 + $0x30] sm:$0xff]  ;;  %23 = vst.msk [vmem:[#allocation2] sm:$0xff] %vm22_vm0, %v229_v2 }
   0x2   :  { %99 = vmatpush.bf16.msra.mxu0 %v197_v0  ;;  %24 = vst.msk [vmem:[#allocation2 + $0x8] sm:$0xff] %vm22_vm0, %v229_v2 }
   0x3   :  { %9 = vsyncpa [#allocation4], 0  ;;  %v195_v3 = vld [vmem:[%s304_s1 + $0x28] sm:$0xff]  ;;  %v194_v4 = vld [vmem:[%s304_s1 + $0x20] sm:$0xff]  ;;  %s141_s13 = sshll.u32 %s307_s4, 4  ;;  %s231_s15 = smov 128   ;;  %s142_s13 = int_to_ptr.hbm [resolvable:$true] %s141_s13 }
   0x4   :  { %v193_v5 = vld [vmem:[%s304_s1 + $0x18] sm:$0xff]  ;;  %v192_v6 = vld [vmem:[%s304_s1 + $0x10] sm:$0xff]  ;;  %v191_v7 = vld [vmem:[%s304_s1 + $0x8] sm:$0xff]  ;;  %s232_s16 = smov 8  }
   0x5   :  { %v190_v8 = vld [vmem:[%s304_s1] sm:$0xff]  ;;  %v130_v22 = vld [vmem:[%s306_s3 + $0x8] sm:$0xff] }
   0x6   :  { %100 = vmatpush.bf16.msra.mxu0 %v196_v1  ;;  %v189_v9 = vld [vmem:[%s303_s0] sm:$0xff]  ;;  %s230_s0 = smov [#allocation3]  }
   0x7   :  { %v202_v14 = vld [vmem:[%s305_s2] ss:$0 sm:$0xff]  ;;  %s139_s10 = sshll.u32 %s230_s0, 4  ;;  %s140_s10 = int_to_ptr.vmem [resolvable:$true] %s139_s10 }
   0x8   :  { %v25_v10 = vld [vmem:[#allocation2] sm:$0xff] }
   0x9   :  { %v26_v13 = vld [vmem:[#allocation2 + $0x8] sm:$0xff]  ;;  %v129_v18 = vld [vmem:[%s306_s3] sm:$0xff] }
   0xa   :  { %101 = vmatpush.bf16.msra.mxu0 %v195_v3 }
   0xe   :  { %102 = vmatpush.bf16.msra.mxu0 %v194_v4 }
  0x12   :  { %103 = vmatpush.bf16.msra.mxu0 %v193_v5 }
  0x16   :  { %104 = vmatpush.bf16.msra.mxu0 %v192_v6 }
  0x1a   :  { %105 = vmatpush.bf16.msra.mxu0 %v191_v7 }
  0x1e   :  { %106 = vmatpush.bf16.msra.mxu0 %v190_v8 }
  0x21   :  { %107 = vmatmul.bf16.vlgmr.msra.gmra.mxu0 %v189_v9 }
  0x9e   :  { %v108_v11 = vpop.f32.mrf.mxu0 }
  0x9f   :  { %v113_v12 = vadd.f32 %v108_v11, %v25_v10 }
  0xa1   :  { %116 = vst.msk [vmem:[#allocation2] sm:$0xff] %vm22_vm0, %v113_v12 }
  0xa6   :  { %v110_v15 = vpop.f32.mrf.mxu0 }
  0xa7   :  { %v114_v16 = vadd.f32 %v110_v15, %v26_v13 }
  0xa8   :  { %v121_v17 = vld [vmem:[#allocation2] sm:$0xff] }
  0xa9   :  { %117 = vst.msk [vmem:[#allocation2 + $0x8] sm:$0xff] %vm22_vm0, %v114_v16  ;;  %v127_v19 = vadd.f32 %v202_v14, %v121_v17 }
  0xab   :  { %v131_v20 = vadd.f32 %v129_v18, %v127_v19 }
  0xad   :  { %133 = vst.msk [vmem:[#allocation3] sm:$0xff] %vm22_vm0, %v131_v20 }
  0xb0   :  { %v122_v21 = vld [vmem:[#allocation2 + $0x8] sm:$0xff] }
  0xb1   :  { %v128_v23 = vadd.f32 %v202_v14, %v122_v21 }
  0xb3   :  { %v132_v24 = vadd.f32 %v130_v22, %v128_v23 }
  0xb5   :  { %134 = vst.msk [vmem:[#allocation3 + $0x8] sm:$0xff] %vm22_vm0, %v132_v24 }
  0xb6   :  { %147 = dma.vmem_to_hbm [thread:$0]  %s140_s10, 256, %s142_s13, [#allocation4], %s231_s15, %s231_s15, %s232_s16  }
  0xb7   :  { %227 = dma.done.wait [#allocation4], 256  }
  0xb8   :  { %228 = vsyncadd [#allocation4], 4294967040 }
  0xb9   :  { %152 = vsyncpa [#allocation4], 1 }

</bundles_post_ra>
